<compile_context>
chip_gen: v5e
topology: v5e:2x2
jax: 0.10.0
libtpu: 0.0.40
codegen_flags: <defaults>
</compile_context>

<pallas_src>
import jax
import jax.numpy as jnp
from jax.experimental import pallas as pl
from jax.experimental.pallas import tpu as pltpu


def _cdiv(a, b):
    return -(-a // b)


def _round_up(a, b):
    return _cdiv(a, b) * b


# ----------------------------------------------------------------------------
# Kernel
# ----------------------------------------------------------------------------

def _fc_clf_kernel(study_ref,                     # scalar-prefetch (SMEM), unused in body
                   x_ref, w1_ref, b1_ref, w2_ref, b2_ref, wh_ref, bh_ref,
                   o_ref, acc_ref):
    """Fused MLP + (pre-selected) classification head.

    Grid = (batch_tiles, din_tiles). Layer-1 matmul accumulates over the Din
    ("arbitrary", last) axis into an f32 VMEM scratch; layers 2/3, tanh and the
    bf16 output store happen only on the final Din step. Matmuls run on the MXU
    in bf16 with f32 accumulation; elementwise math stays in f32.
    """
    del study_ref  # head selection happens in the BlockSpec index_maps
    k = pl.program_id(1)

    @pl.when(k == 0)
    def _():
        acc_ref[...] = jnp.zeros_like(acc_ref)

    # In-kernel cast of the x tile (no separate wrapper cast pass over x).
    acc_ref[...] += jnp.dot(x_ref[...].astype(jnp.bfloat16), w1_ref[...],
                            preferred_element_type=jnp.float32)          # [TB, 256] f32

    @pl.when(k == pl.num_programs(1) - 1)
    def _():
        h1 = jnp.tanh(acc_ref[...] + b1_ref[...])                        # [TB, 256] f32
        h2 = jnp.tanh(jnp.dot(h1.astype(jnp.bfloat16), w2_ref[...],
                              preferred_element_type=jnp.float32)
                      + b2_ref[...])                                     # [TB, 128] f32
        # NOTE: bf16 tanh would be a small EUP/VPU win on v6e/v7x only; kept in
        # f32 for v5e compatibility and tighter accuracy.
        # TODO(synk): nn.Dropout() is identity in eval mode; training-mode
        # dropout (pltpu.prng_* based masking) is not implemented here.
        logits = jnp.dot(h2.astype(jnp.bfloat16), wh_ref[0],
                         preferred_element_type=jnp.float32) + bh_ref[0]  # [TB, C_pad] f32
        o_ref[...] = logits.astype(o_ref.dtype)                          # bf16 store


# ----------------------------------------------------------------------------
# Tiling / wrapper
# ----------------------------------------------------------------------------

def _vmem_budget_bytes():
    """Per-generation scoped-VMEM budget (half of physical, capped at 64 MiB)."""
    try:
        phys = int(pltpu.get_tpu_info().vmem_capacity_bytes)
    except Exception:
        phys = 64 << 20   # conservative (v7x per-core VMEM)
    return min(phys // 2, 64 << 20)


def _pick_batch_tiling(B, TK, C_pad, *, tb_max, vmem_budget):
    """Choose (num_tiles, TB, B_pad) under a VMEM budget, minimizing padding
    and giving the v7x megacore >=2 grid steps for non-tiny batches."""
    # Per-row VMEM bytes: double-buffered f32 x tile, double-buffered bf16 out
    # tile, f32 accumulator, f32 h1/h2 plus their bf16 copies.
    per_row = 2 * TK * 4 + 2 * C_pad * 2 + 256 * 4 + (256 + 128) * (4 + 2)
    # Fixed VMEM: W1 tile (assume double-buffered), W2, selected head, biases,
    # plus compiler scratch slack.
    fixed = (2 * TK * 256 * 2 + 2 * 256 * 128 * 2 + 2 * 128 * C_pad * 2
             + 2 * (256 + 128 + C_pad) * 4 + (1 << 20))
    avail = int(vmem_budget * 0.8) - fixed
    cap = max(8, (min(tb_max, avail // per_row) // 8) * 8)

    num_tiles = max(1, _cdiv(B, cap))
    if B >= 256:           # give both v7x TensorCores work for non-tiny batches
        num_tiles = max(num_tiles, 2)

    if num_tiles == 1:
        return 1, B, B     # full-extent block: no row padding at all
    TB = _round_up(_cdiv(B, num_tiles), 8)
    return num_tiles, TB, num_tiles * TB


def fc_clf_forward(study_vec, x, prep, *, tb_max=1024):
    """prep: dict from prepare_params() with pre-normalized, padded weights.

    x may be f32 or bf16 (cast to bf16 happens in-kernel).
    Returns [B, C_pad] bf16 logits; columns >= nclasses(selected head) are
    exactly zero — callers MUST slice [:, :nclasses] before softmax/argmax.
    Head selection uses study_vec[0] for the whole batch (matches the module).
    """
    B, Din = x.shape
    din_pad, TK, nk = prep["din_pad"], prep["tk"], prep["nk"]
    n_heads, H2, C_pad = prep["wh"].shape

    if Din != din_pad:
        # TODO(synk): one extra pass over x; callers with 128-aligned feature
        # counts (or pre-padded x) skip this entirely.
        x = jnp.pad(x, ((0, 0), (0, din_pad - Din)))

    vmem_budget = _vmem_budget_bytes()
    num_tiles, TB, B_pad = _pick_batch_tiling(
        B, TK, C_pad, tb_max=tb_max, vmem_budget=vmem_budget)
    if B_pad != B:
        x = jnp.pad(x, ((0, B_pad - B), (0, 0)))

    head_idx = study_vec[:1].astype(jnp.int32)      # scalar-prefetch operand, shape (1,)
    grid = (num_tiles, nk)

    cost = pl.CostEstimate(
        flops=2 * B_pad * (din_pad * 256 + 256 * 128 + 128 * C_pad),
        transcendentals=B_pad * (256 + 128),
        bytes_accessed=(B_pad * din_pad * x.dtype.itemsize      # x
                        + din_pad * 256 * 2 + 256 * 128 * 2     # W1, W2 (bf16)
                        + 128 * C_pad * 2 + C_pad * 4           # selected head
                        + B_pad * C_pad * 2),                   # bf16 output
    )

    def build(single_buffer_weights):
        # Constant-index weights only need one VMEM buffer; double-buffering
        # them wastes VMEM that could go to a bigger batch tile.
        const = ({"pipeline_mode": pl.Buffered(1)}
                 if single_buffer_weights else {})
        in_specs = [
            pl.BlockSpec((TB, TK),       lambda i, k, s: (i, k)),            # x tile
            pl.BlockSpec((TK, 256),      lambda i, k, s: (k, 0)),            # W1 K-tile
            pl.BlockSpec((1, 256),       lambda i, k, s: (0, 0), **const),   # b1
            pl.BlockSpec((256, 128),     lambda i, k, s: (0, 0), **const),   # W2
            pl.BlockSpec((1, 128),       lambda i, k, s: (0, 0), **const),   # b2
            pl.BlockSpec((1, H2, C_pad), lambda i, k, s: (s[0], 0, 0), **const),  # head W
            pl.BlockSpec((1, 1, C_pad),  lambda i, k, s: (s[0], 0, 0), **const),  # head b
        ]
        return pl.pallas_call(
            _fc_clf_kernel,
            out_shape=jax.ShapeDtypeStruct((B_pad, C_pad), jnp.bfloat16),
            grid_spec=pltpu.PrefetchScalarGridSpec(
                num_scalar_prefetch=1,
                grid=grid,
                in_specs=in_specs,
                out_specs=pl.BlockSpec((TB, C_pad), lambda i, k, s: (i, 0)),
                scratch_shapes=[pltpu.VMEM((TB, 256), jnp.float32)],
            ),
            compiler_params=pltpu.CompilerParams(
                dimension_semantics=("parallel", "arbitrary"),
                vmem_limit_bytes=vmem_budget),
            cost_estimate=cost,
        )

    args = (head_idx, x, prep["w1"], prep["b1"], prep["w2"], prep["b2"],
            prep["wh"], prep["bh"])
    try:
        out = build(single_buffer_weights=True)(*args)
    except Exception:
        # Older Pallas builds may not accept pipeline_mode=pl.Buffered(1);
        # fall back to default double buffering (correctness identical).
        out = build(single_buffer_weights=False)(*args)
    return out[:B]


# ----------------------------------------------------------------------------
# Parameter construction / preparation (host/XLA side, once per weight update)
# ----------------------------------------------------------------------------

def init_params(key, in_features, head_classes):
    """Deterministic synthetic init matching the module's parameter shapes.
    sizes = [in_features, 256, 128]; one weight-normed head per study.
    v is stored pre-transposed as [in, out]; g is [1, out]."""
    sizes = [in_features, 256, 128]

    def wn_linear_init(k, fan_in, fan_out):
        k1, k2 = jax.random.split(k)
        bound = 1.0 / float(fan_in) ** 0.5
        v = jax.random.uniform(k1, (fan_in, fan_out), jnp.float32, -bound, bound)
        # torch weight_norm init sets g = ||v|| so W == v initially
        g = jnp.sqrt(jnp.sum(v * v, axis=0, keepdims=True))              # [1, out]
        b = jax.random.uniform(k2, (1, fan_out), jnp.float32, -bound, bound)
        return v, g, b

    keys = jax.random.split(key, 2 + len(head_classes))
    v1, g1, b1 = wn_linear_init(keys[0], sizes[0], sizes[1])
    v2, g2, b2 = wn_linear_init(keys[1], sizes[1], sizes[2])
    heads = [wn_linear_init(keys[2 + i], sizes[2], nc)
             for i, nc in enumerate(head_classes)]
    return dict(v1=v1, g1=g1, b1=b1, v2=v2, g2=g2, b2=b2, heads=heads)


def _effective_weight(v, g):
    # No epsilon: matches PyTorch weight_norm (assumes no all-zero v column).
    norm = jnp.sqrt(jnp.sum(v * v, axis=0, keepdims=True))
    return v * (g / norm)


def prepare_params(params, head_classes, *, tk_max=2048):
    """Pre-normalize weight-norm params into effective weights, cast matmul
    operands to bf16, stack heads into a lane-dense zero-padded tensor, and
    choose the Din K-tile (TK) so W1 is zero-padded to nk * TK rows."""
    w1 = _effective_weight(params["v1"], params["g1"]).astype(jnp.bfloat16)
    w2 = _effective_weight(params["v2"], params["g2"]).astype(jnp.bfloat16)
    b1 = params["b1"].astype(jnp.float32)
    b2 = params["b2"].astype(jnp.float32)

    din = int(params["v1"].shape[0])
    nk = max(1, _cdiv(din, tk_max))
    tk = _round_up(_cdiv(din, nk), 128)
    din_pad = nk * tk
    if din_pad != din:
        w1 = jnp.pad(w1, ((0, din_pad - din), (0, 0)))   # zero rows: no logit effect

    n_heads = len(params["heads"])
    h2_dim = int(params["v2"].shape[1])                  # 128
    c_max = max(head_classes)
    c_pad = max(128, _round_up(c_max, 128))              # lane-dense output width

    wh = jnp.zeros((n_heads, h2_dim, c_pad), jnp.float32)
    bh = jnp.zeros((n_heads, 1, c_pad), jnp.float32)
    for i, (v, g, b) in enumerate(params["heads"]):
        w = _effective_weight(v, g)
        wh = wh.at[i, :, : w.shape[1]].set(w)
        bh = bh.at[i, :, : b.shape[1]].set(b)

    return dict(w1=w1, b1=b1, w2=w2, b2=b2,
                wh=wh.astype(jnp.bfloat16), bh=bh,
                din=din, din_pad=din_pad, tk=tk, nk=nk)


# ----------------------------------------------------------------------------
# References for correctness checks
# ----------------------------------------------------------------------------

def _reference_bf16(head_idx, x, prep):
    """Mirrors the kernel's bf16-operand / f32-accumulate / bf16-output math."""
    xb = x.astype(jnp.bfloat16)
    w1 = prep["w1"][: x.shape[1]]
    h1 = jnp.tanh(jnp.dot(xb, w1, preferred_element_type=jnp.float32) + prep["b1"])
    h2 = jnp.tanh(jnp.dot(h1.astype(jnp.bfloat16), prep["w2"],
                          preferred_element_type=jnp.float32) + prep["b2"])
    logits = (jnp.dot(h2.astype(jnp.bfloat16), prep["wh"][head_idx],
                      preferred_element_type=jnp.float32) + prep["bh"][head_idx][0])
    return logits.astype(jnp.bfloat16).astype(jnp.float32)


def _reference_f32(head_idx, x, params):
    """Pure-f32 reference of the original module semantics."""
    def wn(h, v, g, b):
        w = v * (g / jnp.sqrt(jnp.sum(v * v, axis=0, keepdims=True)))
        return h @ w + b
    h = jnp.tanh(wn(x, params["v1"], params["g1"], params["b1"]))
    h = jnp.tanh(wn(h, params["v2"], params["g2"], params["b2"]))
    v, g, b = params["heads"][head_idx]
    return wn(h, v, g, b)


if __name__ == "__main__":
    # constants.original_masked_nnz is not available here; use a small stand-in.
    IN_FEATURES = 512
    HEAD_CLASSES = [10, 7, 5]   # nclasses per study
    B = 4
    STUDY = 1                   # head 1 (7 classes)

    key = jax.random.PRNGKey(0)
    kp, kx = jax.random.split(key)
    params = init_params(kp, IN_FEATURES, HEAD_CLASSES)
    prep = prepare_params(params, HEAD_CLASSES)

    x = jax.random.normal(kx, (B, IN_FEATURES), jnp.float32)
    study_vec = jnp.full((B,), STUDY, dtype=jnp.int32)

    out_pad = jax.block_until_ready(fc_clf_forward(study_vec, x, prep))

    nclasses = HEAD_CLASSES[STUDY]
    out = out_pad[:, :nclasses].astype(jnp.float32)
    assert out.shape == (B, nclasses)

    ref_bf = _reference_bf16(STUDY, x, prep)[:, :nclasses]
    ref_f32 = _reference_f32(STUDY, x, params)
    assert jnp.allclose(out, ref_bf, atol=1e-2, rtol=1e-2), "mismatch vs bf16 reference"
    assert jnp.allclose(out, ref_f32, atol=6e-2, rtol=6e-2), "mismatch vs f32 reference"
    print("KERNEL_OK")
</pallas_src>

<mosaic_0001>
module attributes {stable_mosaic.version = 11 : i64} {
  func.func @_fc_clf_kernel(%arg0: i32, %arg1: i32, %arg2: memref<1xi32, #tpu.memory_space<smem>>, %arg3: memref<4x512xf32, #tpu.memory_space<vmem>>, %arg4: memref<512x256xbf16, #tpu.memory_space<vmem>>, %arg5: memref<1x256xf32, #tpu.memory_space<vmem>>, %arg6: memref<256x128xbf16, #tpu.memory_space<vmem>>, %arg7: memref<1x128xf32, #tpu.memory_space<vmem>>, %arg8: memref<1x128x128xbf16, #tpu.memory_space<vmem>>, %arg9: memref<1x1x128xf32, #tpu.memory_space<vmem>>, %arg10: memref<4x128xbf16, #tpu.memory_space<vmem>>, %arg11: memref<4x256xf32, #tpu.memory_space<vmem>>) attributes {dimension_semantics = [#tpu.dimension_semantics<parallel>, #tpu.dimension_semantics<arbitrary>], iteration_bounds = array<i64: 1, 1>, scalar_prefetch = 1 : i64, scratch_operands = 1 : i64, tpu.core_type = #tpu.core_type<tc>, window_params = [{transform_indices = @transform_0, window_bounds = array<i64: 4, 512>}, {transform_indices = @transform_1, window_bounds = array<i64: 512, 256>}, {pipeline_mode = #tpu.pipeline_mode<synchronous>, transform_indices = @transform_2, window_bounds = array<i64: 1, 256>}, {pipeline_mode = #tpu.pipeline_mode<synchronous>, transform_indices = @transform_3, window_bounds = array<i64: 256, 128>}, {pipeline_mode = #tpu.pipeline_mode<synchronous>, transform_indices = @transform_4, window_bounds = array<i64: 1, 128>}, {pipeline_mode = #tpu.pipeline_mode<synchronous>, transform_indices = @transform_5, window_bounds = array<i64: 1, 128, 128>}, {pipeline_mode = #tpu.pipeline_mode<synchronous>, transform_indices = @transform_6, window_bounds = array<i64: 1, 1, 128>}, {transform_indices = @transform_7, window_bounds = array<i64: 4, 128>}]} {
    %c0_i32 = arith.constant 0 : i32
    %0 = arith.cmpi eq, %arg1, %c0_i32 : i32
    %1 = arith.extui %0 : i1 to i32
    %c0_i32_0 = arith.constant 0 : i32
    %2 = arith.cmpi ne, %1, %c0_i32_0 : i32
    scf.if %2 {
      %cst_10 = arith.constant 0.000000e+00 : f32
      %13 = vector.broadcast %cst_10 : f32 to vector<4x256xf32>
      %c0_11 = arith.constant 0 : index
      %c0_12 = arith.constant 0 : index
      %14 = vector.load %arg11[%c0_11, %c0_12] : memref<4x256xf32, #tpu.memory_space<vmem>>, vector<4x256xf32>
      tpu.vector_store %arg11[%c0_11, %c0_12], %13 {strides = array<i32>} : memref<4x256xf32, #tpu.memory_space<vmem>>, vector<4x256xf32>,
    } else {
    }
    %c0 = arith.constant 0 : index
    %c0_1 = arith.constant 0 : index
    %3 = vector.load %arg11[%c0, %c0_1] : memref<4x256xf32, #tpu.memory_space<vmem>>, vector<4x256xf32>
    %c0_2 = arith.constant 0 : index
    %c0_3 = arith.constant 0 : index
    %4 = vector.load %arg3[%c0_2, %c0_3] : memref<4x512xf32, #tpu.memory_space<vmem>>, vector<4x512xf32>
    %5 = arith.truncf %4 : vector<4x512xf32> to vector<4x512xbf16>
    %c0_4 = arith.constant 0 : index
    %c0_5 = arith.constant 0 : index
    %6 = vector.load %arg4[%c0_4, %c0_5] : memref<512x256xbf16, #tpu.memory_space<vmem>>, vector<512x256xbf16>
    %cst = arith.constant dense<0.000000e+00> : vector<4x256xf32>
    %7 = tpu.matmul %5, %6, %cst {dimension_numbers = #tpu.dot_dimension_numbers<[1], [0], [0], [1], [0, 0, 1, 1], [], []>} : vector<4x512xbf16>, vector<512x256xbf16>, vector<4x256xf32> -> vector<4x256xf32>
    %8 = arith.addf %3, %7 : vector<4x256xf32>
    %c0_6 = arith.constant 0 : index
    %c0_7 = arith.constant 0 : index
    %9 = vector.load %arg11[%c0_6, %c0_7] : memref<4x256xf32, #tpu.memory_space<vmem>>, vector<4x256xf32>
    tpu.vector_store %arg11[%c0_6, %c0_7], %8 {strides = array<i32>} : memref<4x256xf32, #tpu.memory_space<vmem>>, vector<4x256xf32>,
    %c0_i32_8 = arith.constant 0 : i32
    %10 = arith.cmpi eq, %arg1, %c0_i32_8 : i32
    %11 = arith.extui %10 : i1 to i32
    %c0_i32_9 = arith.constant 0 : i32
    %12 = arith.cmpi ne, %11, %c0_i32_9 : i32
    scf.if %12 {
      %c0_10 = arith.constant 0 : index
      %c0_11 = arith.constant 0 : index
      %13 = vector.load %arg11[%c0_10, %c0_11] : memref<4x256xf32, #tpu.memory_space<vmem>>, vector<4x256xf32>
      %c0_12 = arith.constant 0 : index
      %c0_13 = arith.constant 0 : index
      %14 = vector.load %arg5[%c0_12, %c0_13] : memref<1x256xf32, #tpu.memory_space<vmem>>, vector<1x256xf32>
      %15 = vector.broadcast %14 : vector<1x256xf32> to vector<4x256xf32>
      %16 = arith.addf %13, %15 : vector<4x256xf32>
      %17 = math.tanh %16 : vector<4x256xf32>
      %18 = arith.truncf %17 : vector<4x256xf32> to vector<4x256xbf16>
      %c0_14 = arith.constant 0 : index
      %c0_15 = arith.constant 0 : index
      %19 = vector.load %arg6[%c0_14, %c0_15] : memref<256x128xbf16, #tpu.memory_space<vmem>>, vector<256x128xbf16>
      %cst_16 = arith.constant dense<0.000000e+00> : vector<4x128xf32>
      %20 = tpu.matmul %18, %19, %cst_16 {dimension_numbers = #tpu.dot_dimension_numbers<[1], [0], [0], [1], [0, 0, 1, 1], [], []>} : vector<4x256xbf16>, vector<256x128xbf16>, vector<4x128xf32> -> vector<4x128xf32>
      %c0_17 = arith.constant 0 : index
      %c0_18 = arith.constant 0 : index
      %21 = vector.load %arg7[%c0_17, %c0_18] : memref<1x128xf32, #tpu.memory_space<vmem>>, vector<1x128xf32>
      %22 = vector.broadcast %21 : vector<1x128xf32> to vector<4x128xf32>
      %23 = arith.addf %20, %22 : vector<4x128xf32>
      %24 = math.tanh %23 : vector<4x128xf32>
      %25 = arith.truncf %24 : vector<4x128xf32> to vector<4x128xbf16>
      %c0_19 = arith.constant 0 : index
      %c0_20 = arith.constant 0 : index
      %c0_21 = arith.constant 0 : index
      %26 = vector.load %arg8[%c0_19, %c0_20, %c0_21] : memref<1x128x128xbf16, #tpu.memory_space<vmem>>, vector<1x128x128xbf16>
      %27 = vector.shape_cast %26 : vector<1x128x128xbf16> to vector<128x128xbf16>
      %cst_22 = arith.constant dense<0.000000e+00> : vector<4x128xf32>
      %28 = tpu.matmul %25, %27, %cst_22 {dimension_numbers = #tpu.dot_dimension_numbers<[1], [0], [0], [1], [0, 0, 1, 1], [], []>} : vector<4x128xbf16>, vector<128x128xbf16>, vector<4x128xf32> -> vector<4x128xf32>
      %c0_23 = arith.constant 0 : index
      %c0_24 = arith.constant 0 : index
      %c0_25 = arith.constant 0 : index
      %29 = vector.load %arg9[%c0_23, %c0_24, %c0_25] : memref<1x1x128xf32, #tpu.memory_space<vmem>>, vector<1x1x128xf32>
      %30 = vector.shape_cast %29 : vector<1x1x128xf32> to vector<1x128xf32>
      %31 = vector.broadcast %30 : vector<1x128xf32> to vector<4x128xf32>
      %32 = arith.addf %28, %31 : vector<4x128xf32>
      %33 = arith.truncf %32 : vector<4x128xf32> to vector<4x128xbf16>
      %c0_26 = arith.constant 0 : index
      %c0_27 = arith.constant 0 : index
      %34 = vector.load %arg10[%c0_26, %c0_27] : memref<4x128xbf16, #tpu.memory_space<vmem>>, vector<4x128xbf16>
      tpu.vector_store %arg10[%c0_26, %c0_27], %33 {strides = array<i32>} : memref<4x128xbf16, #tpu.memory_space<vmem>>, vector<4x128xbf16>,
    } else {
    }
    return
  }
  func.func @transform_0(%arg0: i32, %arg1: i32, %arg2: memref<1xi32, #tpu.memory_space<smem>>) -> (i32, i32) {
    %c0_i32 = arith.constant 0 : i32
    return %arg0, %arg1 : i32, i32
  }
  func.func @transform_1(%arg0: i32, %arg1: i32, %arg2: memref<1xi32, #tpu.memory_space<smem>>) -> (i32, i32) {
    %c0_i32 = arith.constant 0 : i32
    %c0_i32_0 = arith.constant 0 : i32
    return %arg1, %c0_i32 : i32, i32
  }
  func.func @transform_2(%arg0: i32, %arg1: i32, %arg2: memref<1xi32, #tpu.memory_space<smem>>) -> (i32, i32) {
    %c0_i32 = arith.constant 0 : i32
    %c0_i32_0 = arith.constant 0 : i32
    %c0_i32_1 = arith.constant 0 : i32
    return %c0_i32, %c0_i32_0 : i32, i32
  }
  func.func @transform_3(%arg0: i32, %arg1: i32, %arg2: memref<1xi32, #tpu.memory_space<smem>>) -> (i32, i32) {
    %c0_i32 = arith.constant 0 : i32
    %c0_i32_0 = arith.constant 0 : i32
    %c0_i32_1 = arith.constant 0 : i32
    return %c0_i32, %c0_i32_0 : i32, i32
  }
  func.func @transform_4(%arg0: i32, %arg1: i32, %arg2: memref<1xi32, #tpu.memory_space<smem>>) -> (i32, i32) {
    %c0_i32 = arith.constant 0 : i32
    %c0_i32_0 = arith.constant 0 : i32
    %c0_i32_1 = arith.constant 0 : i32
    return %c0_i32, %c0_i32_0 : i32, i32
  }
  func.func @transform_5(%arg0: i32, %arg1: i32, %arg2: memref<1xi32, #tpu.memory_space<smem>>) -> (i32, i32, i32) {
    %c0 = arith.constant 0 : index
    %0 = memref.load %arg2[%c0] : memref<1xi32, #tpu.memory_space<smem>>
    %c0_i32 = arith.constant 0 : i32
    %c0_i32_0 = arith.constant 0 : i32
    %c0_i32_1 = arith.constant 0 : i32
    return %0, %c0_i32, %c0_i32_0 : i32, i32, i32
  }
  func.func @transform_6(%arg0: i32, %arg1: i32, %arg2: memref<1xi32, #tpu.memory_space<smem>>) -> (i32, i32, i32) {
    %c0 = arith.constant 0 : index
    %0 = memref.load %arg2[%c0] : memref<1xi32, #tpu.memory_space<smem>>
    %c0_i32 = arith.constant 0 : i32
    %c0_i32_0 = arith.constant 0 : i32
    %c0_i32_1 = arith.constant 0 : i32
    return %0, %c0_i32, %c0_i32_0 : i32, i32, i32
  }
  func.func @transform_7(%arg0: i32, %arg1: i32, %arg2: memref<1xi32, #tpu.memory_space<smem>>) -> (i32, i32) {
    %c0_i32 = arith.constant 0 : i32
    %c0_i32_0 = arith.constant 0 : i32
    return %arg0, %c0_i32 : i32, i32
  }
}

module attributes {stable_mosaic.version = 11 : i64} {
  func.func @_fc_clf_kernel(%arg0: i32, %arg1: i32, %arg2: memref<1xi32, #tpu.memory_space<smem>>, %arg3: memref<4x512xf32, #tpu.memory_space<vmem>>, %arg4: memref<512x256xbf16, #tpu.memory_space<vmem>>, %arg5: memref<1x256xf32, #tpu.memory_space<vmem>>, %arg6: memref<256x128xbf16, #tpu.memory_space<vmem>>, %arg7: memref<1x128xf32, #tpu.memory_space<vmem>>, %arg8: memref<1x128x128xbf16, #tpu.memory_space<vmem>>, %arg9: memref<1x1x128xf32, #tpu.memory_space<vmem>>, %arg10: memref<4x128xbf16, #tpu.memory_space<vmem>>, %arg11: memref<4x256xf32, #tpu.memory_space<vmem>>) attributes {dimension_semantics = [#tpu.dimension_semantics<parallel>, #tpu.dimension_semantics<arbitrary>], iteration_bounds = array<i64: 1, 1>, scalar_prefetch = 1 : i64, scratch_operands = 1 : i64, tpu.core_type = #tpu.core_type<tc>, window_params = [{transform_indices = @transform_0, window_bounds = array<i64: 4, 512>}, {transform_indices = @transform_1, window_bounds = array<i64: 512, 256>}, {pipeline_mode = #tpu.pipeline_mode<synchronous>, transform_indices = @transform_2, window_bounds = array<i64: 1, 256>}, {pipeline_mode = #tpu.pipeline_mode<synchronous>, transform_indices = @transform_3, window_bounds = array<i64: 256, 128>}, {pipeline_mode = #tpu.pipeline_mode<synchronous>, transform_indices = @transform_4, window_bounds = array<i64: 1, 128>}, {transform_indices = @transform_5, window_bounds = array<i64: 1, 128, 128>}, {transform_indices = @transform_6, window_bounds = array<i64: 1, 1, 128>}, {transform_indices = @transform_7, window_bounds = array<i64: 4, 128>}]} {
    %c0_i32 = arith.constant 0 : i32
    %0 = arith.cmpi eq, %arg1, %c0_i32 : i32
    %1 = arith.extui %0 : i1 to i32
    %c0_i32_0 = arith.constant 0 : i32
    %2 = arith.cmpi ne, %1, %c0_i32_0 : i32
    scf.if %2 {
      %cst_10 = arith.constant 0.000000e+00 : f32
      %13 = vector.broadcast %cst_10 : f32 to vector<4x256xf32>
      %c0_11 = arith.constant 0 : index
      %c0_12 = arith.constant 0 : index
      %14 = vector.load %arg11[%c0_11, %c0_12] : memref<4x256xf32, #tpu.memory_space<vmem>>, vector<4x256xf32>
      tpu.vector_store %arg11[%c0_11, %c0_12], %13 {strides = array<i32>} : memref<4x256xf32, #tpu.memory_space<vmem>>, vector<4x256xf32>,
    } else {
    }
    %c0 = arith.constant 0 : index
    %c0_1 = arith.constant 0 : index
    %3 = vector.load %arg11[%c0, %c0_1] : memref<4x256xf32, #tpu.memory_space<vmem>>, vector<4x256xf32>
    %c0_2 = arith.constant 0 : index
    %c0_3 = arith.constant 0 : index
    %4 = vector.load %arg3[%c0_2, %c0_3] : memref<4x512xf32, #tpu.memory_space<vmem>>, vector<4x512xf32>
    %5 = arith.truncf %4 : vector<4x512xf32> to vector<4x512xbf16>
    %c0_4 = arith.constant 0 : index
    %c0_5 = arith.constant 0 : index
    %6 = vector.load %arg4[%c0_4, %c0_5] : memref<512x256xbf16, #tpu.memory_space<vmem>>, vector<512x256xbf16>
    %cst = arith.constant dense<0.000000e+00> : vector<4x256xf32>
    %7 = tpu.matmul %5, %6, %cst {dimension_numbers = #tpu.dot_dimension_numbers<[1], [0], [0], [1], [0, 0, 1, 1], [], []>} : vector<4x512xbf16>, vector<512x256xbf16>, vector<4x256xf32> -> vector<4x256xf32>
    %8 = arith.addf %3, %7 : vector<4x256xf32>
    %c0_6 = arith.constant 0 : index
    %c0_7 = arith.constant 0 : index
    %9 = vector.load %arg11[%c0_6, %c0_7] : memref<4x256xf32, #tpu.memory_space<vmem>>, vector<4x256xf32>
    tpu.vector_store %arg11[%c0_6, %c0_7], %8 {strides = array<i32>} : memref<4x256xf32, #tpu.memory_space<vmem>>, vector<4x256xf32>,
    %c0_i32_8 = arith.constant 0 : i32
    %10 = arith.cmpi eq, %arg1, %c0_i32_8 : i32
    %11 = arith.extui %10 : i1 to i32
    %c0_i32_9 = arith.constant 0 : i32
    %12 = arith.cmpi ne, %11, %c0_i32_9 : i32
    scf.if %12 {
      %c0_10 = arith.constant 0 : index
      %c0_11 = arith.constant 0 : index
      %13 = vector.load %arg11[%c0_10, %c0_11] : memref<4x256xf32, #tpu.memory_space<vmem>>, vector<4x256xf32>
      %c0_12 = arith.constant 0 : index
      %c0_13 = arith.constant 0 : index
      %14 = vector.load %arg5[%c0_12, %c0_13] : memref<1x256xf32, #tpu.memory_space<vmem>>, vector<1x256xf32>
      %15 = vector.broadcast %14 : vector<1x256xf32> to vector<4x256xf32>
      %16 = arith.addf %13, %15 : vector<4x256xf32>
      %17 = math.tanh %16 : vector<4x256xf32>
      %18 = arith.truncf %17 : vector<4x256xf32> to vector<4x256xbf16>
      %c0_14 = arith.constant 0 : index
      %c0_15 = arith.constant 0 : index
      %19 = vector.load %arg6[%c0_14, %c0_15] : memref<256x128xbf16, #tpu.memory_space<vmem>>, vector<256x128xbf16>
      %cst_16 = arith.constant dense<0.000000e+00> : vector<4x128xf32>
      %20 = tpu.matmul %18, %19, %cst_16 {dimension_numbers = #tpu.dot_dimension_numbers<[1], [0], [0], [1], [0, 0, 1, 1], [], []>} : vector<4x256xbf16>, vector<256x128xbf16>, vector<4x128xf32> -> vector<4x128xf32>
      %c0_17 = arith.constant 0 : index
      %c0_18 = arith.constant 0 : index
      %21 = vector.load %arg7[%c0_17, %c0_18] : memref<1x128xf32, #tpu.memory_space<vmem>>, vector<1x128xf32>
      %22 = vector.broadcast %21 : vector<1x128xf32> to vector<4x128xf32>
      %23 = arith.addf %20, %22 : vector<4x128xf32>
      %24 = math.tanh %23 : vector<4x128xf32>
      %25 = arith.truncf %24 : vector<4x128xf32> to vector<4x128xbf16>
      %c0_19 = arith.constant 0 : index
      %c0_20 = arith.constant 0 : index
      %c0_21 = arith.constant 0 : index
      %26 = vector.load %arg8[%c0_19, %c0_20, %c0_21] : memref<1x128x128xbf16, #tpu.memory_space<vmem>>, vector<1x128x128xbf16>
      %27 = vector.shape_cast %26 : vector<1x128x128xbf16> to vector<128x128xbf16>
      %cst_22 = arith.constant dense<0.000000e+00> : vector<4x128xf32>
      %28 = tpu.matmul %25, %27, %cst_22 {dimension_numbers = #tpu.dot_dimension_numbers<[1], [0], [0], [1], [0, 0, 1, 1], [], []>} : vector<4x128xbf16>, vector<128x128xbf16>, vector<4x128xf32> -> vector<4x128xf32>
      %c0_23 = arith.constant 0 : index
      %c0_24 = arith.constant 0 : index
      %c0_25 = arith.constant 0 : index
      %29 = vector.load %arg9[%c0_23, %c0_24, %c0_25] : memref<1x1x128xf32, #tpu.memory_space<vmem>>, vector<1x1x128xf32>
      %30 = vector.shape_cast %29 : vector<1x1x128xf32> to vector<1x128xf32>
      %31 = vector.broadcast %30 : vector<1x128xf32> to vector<4x128xf32>
      %32 = arith.addf %28, %31 : vector<4x128xf32>
      %33 = arith.truncf %32 : vector<4x128xf32> to vector<4x128xbf16>
      %c0_26 = arith.constant 0 : index
      %c0_27 = arith.constant 0 : index
      %34 = vector.load %arg10[%c0_26, %c0_27] : memref<4x128xbf16, #tpu.memory_space<vmem>>, vector<4x128xbf16>
      tpu.vector_store %arg10[%c0_26, %c0_27], %33 {strides = array<i32>} : memref<4x128xbf16, #tpu.memory_space<vmem>>, vector<4x128xbf16>,
    } else {
    }
    return
  }
  func.func @transform_0(%arg0: i32, %arg1: i32, %arg2: memref<1xi32, #tpu.memory_space<smem>>) -> (i32, i32) {
    %c0_i32 = arith.constant 0 : i32
    return %arg0, %arg1 : i32, i32
  }
  func.func @transform_1(%arg0: i32, %arg1: i32, %arg2: memref<1xi32, #tpu.memory_space<smem>>) -> (i32, i32) {
    %c0_i32 = arith.constant 0 : i32
    %c0_i32_0 = arith.constant 0 : i32
    return %arg1, %c0_i32 : i32, i32
  }
  func.func @transform_2(%arg0: i32, %arg1: i32, %arg2: memref<1xi32, #tpu.memory_space<smem>>) -> (i32, i32) {
    %c0_i32 = arith.constant 0 : i32
    %c0_i32_0 = arith.constant 0 : i32
    %c0_i32_1 = arith.constant 0 : i32
    return %c0_i32, %c0_i32_0 : i32, i32
  }
  func.func @transform_3(%arg0: i32, %arg1: i32, %arg2: memref<1xi32, #tpu.memory_space<smem>>) -> (i32, i32) {
    %c0_i32 = arith.constant 0 : i32
    %c0_i32_0 = arith.constant 0 : i32
    %c0_i32_1 = arith.constant 0 : i32
    return %c0_i32, %c0_i32_0 : i32, i32
  }
  func.func @transform_4(%arg0: i32, %arg1: i32, %arg2: memref<1xi32, #tpu.memory_space<smem>>) -> (i32, i32) {
    %c0_i32 = arith.constant 0 : i32
    %c0_i32_0 = arith.constant 0 : i32
    %c0_i32_1 = arith.constant 0 : i32
    return %c0_i32, %c0_i32_0 : i32, i32
  }
  func.func @transform_5(%arg0: i32, %arg1: i32, %arg2: memref<1xi32, #tpu.memory_space<smem>>) -> (i32, i32, i32) {
    %c0 = arith.constant 0 : index
    %0 = memref.load %arg2[%c0] : memref<1xi32, #tpu.memory_space<smem>>
    %c0_i32 = arith.constant 0 : i32
    %c0_i32_0 = arith.constant 0 : i32
    %c0_i32_1 = arith.constant 0 : i32
    return %0, %c0_i32, %c0_i32_0 : i32, i32, i32
  }
  func.func @transform_6(%arg0: i32, %arg1: i32, %arg2: memref<1xi32, #tpu.memory_space<smem>>) -> (i32, i32, i32) {
    %c0 = arith.constant 0 : index
    %0 = memref.load %arg2[%c0] : memref<1xi32, #tpu.memory_space<smem>>
    %c0_i32 = arith.constant 0 : i32
    %c0_i32_0 = arith.constant 0 : i32
    %c0_i32_1 = arith.constant 0 : i32
    return %0, %c0_i32, %c0_i32_0 : i32, i32, i32
  }
  func.func @transform_7(%arg0: i32, %arg1: i32, %arg2: memref<1xi32, #tpu.memory_space<smem>>) -> (i32, i32) {
    %c0_i32 = arith.constant 0 : i32
    %c0_i32_0 = arith.constant 0 : i32
    return %arg0, %c0_i32 : i32, i32
  }
}

</mosaic_0001>

<bundles_post_ra>
// kernel: tpu_custom_call.1
= control target key start
LH: loop header
LB: loop body
LE: loop exit
PB: predicated region body
PF: predicated region fallthrough
CT: control target
= control target key end

     0   :  { %14 = vsyncpa [#allocation6], 0  ;;  %s1652_s0 = inlined_call_operand.<no memory space> [shape: s32[1], index: 0, kind: input, shape index: {}]   ;;  %s1653_s1 = inlined_call_operand.hbm [shape: f32[4,512], index: 1, kind: input, shape index: {}]   ;;  %s1654_s2 = inlined_call_operand.hbm [shape: bf16[512,256], index: 2, kind: input, shape index: {}]   ;;  %s1655_s3 = inlined_call_operand.vmem [shape: f32[1,256], index: 3, kind: input, shape index: {}]   ;;  %s1656_s4 = inlined_call_operand.hbm [shape: bf16[256,128], index: 4, kind: input, shape index: {}]   ;;  %s1657_s5 = inlined_call_operand.hbm [shape: f32[1,128], index: 5, kind: input, shape index: {}]   ;;  %s1658_s6 = inlined_call_operand.hbm [shape: bf16[3,128,128], index: 6, kind: input, shape index: {}]   ;;  %s1659_s7 = inlined_call_operand.vmem [shape: f32[3,1,128], index: 7, kind: input, shape index: {}]   ;;  %s1660_s8 = inlined_call_operand.hbm [shape: bf16[4,128], index: 8, kind: output, shape index: {}]  }
   0x1   :  { %15 = vsyncpa [#allocation9], 0 }
   0x2   :  { %16 = vsyncpa [#allocation12], 0  ;;  %s33_s29 = sshll.u32 %s1654_s2, 4  ;;  %s34_s29 = int_to_ptr.hbm [resolvable:$true] %s33_s29 }
   0x3   :  { %17 = vsyncpa [#allocation7], 0  ;;  %s1542_s30 = smov [#allocation8]   ;;  %s62_s12 = sshll.u32 %s1657_s5, 4  ;;  %s63_s12 = int_to_ptr.hbm [resolvable:$true] %s62_s12 }
   0x4   :  { %s35_s9 = sshll.u32 %s1542_s30, 4  ;;  %s1543_s13 = smov 128   ;;  %s36_s9 = int_to_ptr.vmem [resolvable:$true] %s35_s9 }
   0x5   :  { %s1544_s14 = smov 8   ;;  %s1545_s15 = smov [#allocation11]  }
   0x6   :  { %41 = dma.hbm_to_vmem [thread:$0]  %s34_s29, 8192, %s36_s9, [#allocation9], %s1543_s13, %s1543_s13, %s1544_s14  }
   0x7   :  { %s64_s16 = sshll.u32 %s1545_s15, 4  ;;  %s23_s19 = sshll.u32 %s1653_s1, 4  ;;  %s65_s16 = int_to_ptr.vmem [resolvable:$true] %s64_s16  ;;  %s24_s19 = int_to_ptr.hbm [resolvable:$true] %s23_s19 }
   0x8   :  { %67 = dma.hbm_to_vmem [thread:$0]  %s63_s12, 16, %s65_s16, [#allocation12]  }
   0x9   :  { %s48_s21 = sshll.u32 %s1656_s4, 4  ;;  %s1546_s22 = smov [#allocation5]   ;;  %s49_s21 = int_to_ptr.hbm [resolvable:$true] %s48_s21 }
   0xa   :  { %s25_s23 = sshll.u32 %s1546_s22, 4  ;;  %s1547_s5 = smov [#allocation10]   ;;  %s26_s23 = int_to_ptr.vmem [resolvable:$true] %s25_s23 }
   0xb   :  { %28 = dma.hbm_to_vmem [thread:$0]  %s24_s19, 256, %s26_s23, [#allocation6]  }
   0xc   :  { %s50_s24 = sshll.u32 %s1547_s5, 4  ;;  %s1548_s25 = smov 64   ;;  %s51_s24 = int_to_ptr.vmem [resolvable:$true] %s50_s24 }
   0xd   :  { %s1549_s26 = smov 4   ;;  %s1285_s28 = sshll.u32 %s1652_s0, 6 }
   0xe   :  { %56 = dma.hbm_to_vmem [thread:$0]  %s49_s21, 2048, %s51_s24, [#allocation9], %s1548_s25, %s1548_s25, %s1549_s26  }
   0xf   :  { %s75_s9 = scalar_lea.hbm %s1658_s6, %s1285_s28  ;;  %s1550_s4 = smov [#allocation13]  }
  0x10   :  { %s78_s10 = sshll.u32 %s1550_s4, 4  ;;  %s76_s11 = sshll.u32 %s75_s9, 4  ;;  %s79_s10 = int_to_ptr.vmem [resolvable:$true] %s78_s10  ;;  %s77_s11 = int_to_ptr.hbm [resolvable:$true] %s76_s11 }
  0x11   :  { %s1486_s12 = sshra.s32 %s77_s11, 4  ;;  %s1490_s16 = scalar_lea.hbm %s1658_s6, 192  ;;  %s1487_s12 = int_to_ptr.hbm [resolvable:$true] %s1486_s12 }
  0x12   :  { %s1488_s13 = scalar_lea.hbm %s1487_s12, 64  ;;  %p1491_p1 = scmp.lt.s32.totalorder %s1487_s12, %s1658_s6 }
  0x13   :  { %p1489_p0 = scmp.ne.s32.totalorder %s1487_s12, %s1488_s13  ;;  %p1492_p2 = scmp.lt.s32.totalorder %s1490_s16, %s1488_s13 }
  0x15   :  { %p1493_p3 = por %p1492_p2, %p1491_p1 }
  0x17   :  { %p1494_p4 = pnand %p1493_p3, %p1489_p0 }
  0x19   :  { %1497 = shalt.err (!%p1494_p4)
}
  0x1a   :  { %84 = dma.hbm_to_vmem [thread:$0]  %s77_s11, 1024, %s79_s10, [#allocation12], %s1548_s25, %s1548_s25, %s1549_s26  }
  0x1b   :  { %1534 = dma.done.wait [#allocation6], 256  }
  0x1c   :  { %1535 = vsyncadd [#allocation6], 4294967040 }
  0x1d   :  { %1536 = dma.done.wait [#allocation9], 10240  }
  0x1e   :  { %1537 = vsyncadd [#allocation9], 4294957056 }
  0x1f   :  { %1538 = dma.done.wait [#allocation12], 1040  }
  0x20   :  { %1539 = vsyncadd [#allocation12], 4294966256  ;;  %v991_v0 = vld [vmem:[#allocation8 + $0x70] sm:$0xf]  ;;  %v1301_v1 = vld [vmem:[#allocation8 + $0x74] sm:$0xf0] }
  0x21   :  { %v1055_v2 = vld [vmem:[#allocation8 + $0xf0] sm:$0xf]  ;;  %v992_v3 = vor.u32 %v1301_v1, %v991_v0  ;;  %v1317_v4 = vld [vmem:[#allocation8 + $0xf4] sm:$0xf0]  ;;  %v983_v11 = vld [vmem:[#allocation8 + $0x60] sm:$0xf] }
  0x22   :  { %v1119_v5 = vld [vmem:[#allocation8 + $0x170] sm:$0xf]  ;;  %v1333_v6 = vld [vmem:[#allocation8 + $0x174] sm:$0xf0]  ;;  %v1056_v7 = vor.u32 %v1317_v4, %v1055_v2  ;;  %v1299_v13 = vld [vmem:[#allocation8 + $0x64] sm:$0xf0] }
  0x23   :  { %v1120_v8 = vor.u32 %v1333_v6, %v1119_v5  ;;  %v1183_v9 = vld [vmem:[#allocation8 + $0x1f0] sm:$0xf]  ;;  %v1349_v10 = vld [vmem:[#allocation8 + $0x1f4] sm:$0xf0]  ;;  %531 = vmatpush.bf16.msra.mxu0 %v992_v3  ;;  %v1047_v14 = vld [vmem:[#allocation8 + $0xe0] sm:$0xf]  ;;  %v984_v16 = vor.u32 %v1299_v13, %v983_v11 }
  0x24   :  { %v1184_v12 = vor.u32 %v1349_v10, %v1183_v9  ;;  %v1315_v15 = vld [vmem:[#allocation8 + $0xe4] sm:$0xf0]  ;;  %544 = vmatpush.bf16.msra.mxu1 %v1056_v7  ;;  %v1111_v18 = vld [vmem:[#allocation8 + $0x160] sm:$0xf]  ;;  %v975_v23 = vld [vmem:[#allocation8 + $0x50] sm:$0xf] }
  0x25   :  { %557 = vmatpush.bf16.msra.mxu2 %v1120_v8  ;;  %v1048_v17 = vor.u32 %v1315_v15, %v1047_v14  ;;  %v1331_v19 = vld [vmem:[#allocation8 + $0x164] sm:$0xf0]  ;;  %v1175_v20 = vld [vmem:[#allocation8 + $0x1e0] sm:$0xf]  ;;  %v1297_v24 = vld [vmem:[#allocation8 + $0x54] sm:$0xf0] }
  0x26   :  { %570 = vmatpush.bf16.msra.mxu3 %v1184_v12  ;;  %v1112_v21 = vor.u32 %v1331_v19, %v1111_v18  ;;  %v1347_v22 = vld [vmem:[#allocation8 + $0x1e4] sm:$0xf0]  ;;  %v1039_v26 = vld [vmem:[#allocation8 + $0xd0] sm:$0xf]  ;;  %v1313_v27 = vld [vmem:[#allocation8 + $0xd4] sm:$0xf0]  ;;  %v976_v29 = vor.u32 %v1297_v24, %v975_v23 }
  0x27   :  { %v1176_v25 = vor.u32 %v1347_v22, %v1175_v20  ;;  %v1103_v28 = vld [vmem:[#allocation8 + $0x150] sm:$0xf]  ;;  %532 = vmatpush.bf16.msra.mxu0 %v984_v16  ;;  %v1329_v30 = vld [vmem:[#allocation8 + $0x154] sm:$0xf0]  ;;  %v1040_v33 = vor.u32 %v1313_v27, %v1039_v26  ;;  %v967_v35 = vld [vmem:[#allocation8 + $0x40] sm:$0xf] }
  0x28   :  { %v1167_v31 = vld [vmem:[#allocation8 + $0x1d0] sm:$0xf]  ;;  %v1345_v32 = vld [vmem:[#allocation8 + $0x1d4] sm:$0xf0]  ;;  %545 = vmatpush.bf16.msra.mxu1 %v1048_v17  ;;  %v1104_v34 = vor.u32 %v1329_v30, %v1103_v28  ;;  %v1295_v36 = vld [vmem:[#allocation8 + $0x44] sm:$0xf0] }
  0x29   :  { %558 = vmatpush.bf16.msra.mxu2 %v1112_v21  ;;  %v1031_v37 = vld [vmem:[#allocation8 + $0xc0] sm:$0xf]  ;;  %v1168_v38 = vor.u32 %v1345_v32, %v1167_v31  ;;  %v1311_v39 = vld [vmem:[#allocation8 + $0xc4] sm:$0xf0]  ;;  %v968_v44 = vor.u32 %v1295_v36, %v967_v35  ;;  %v959_v47 = vld [vmem:[#allocation8 + $0x30] sm:$0xf] }
  0x2a   :  { %571 = vmatpush.bf16.msra.mxu3 %v1176_v25  ;;  %v1095_v40 = vld [vmem:[#allocation8 + $0x140] sm:$0xf]  ;;  %v1327_v41 = vld [vmem:[#allocation8 + $0x144] sm:$0xf0]  ;;  %v1032_v45 = vor.u32 %v1311_v39, %v1031_v37  ;;  %v1293_v48 = vld [vmem:[#allocation8 + $0x34] sm:$0xf0] }
  0x2b   :  { %v1159_v42 = vld [vmem:[#allocation8 + $0x1c0] sm:$0xf]  ;;  %v1343_v43 = vld [vmem:[#allocation8 + $0x1c4] sm:$0xf0]  ;;  %533 = vmatpush.bf16.msra.mxu0 %v976_v29  ;;  %v1096_v46 = vor.u32 %v1327_v41, %v1095_v40  ;;  %v1023_v49 = vld [vmem:[#allocation8 + $0xb0] sm:$0xf]  ;;  %v960_v56 = vor.u32 %v1293_v48, %v959_v47 }
  0x2c   :  { %546 = vmatpush.bf16.msra.mxu1 %v1040_v33  ;;  %v1160_v50 = vor.u32 %v1343_v43, %v1159_v42  ;;  %v1309_v51 = vld [vmem:[#allocation8 + $0xb4] sm:$0xf0]  ;;  %v1087_v52 = vld [vmem:[#allocation8 + $0x130] sm:$0xf]  ;;  %v951_v59 = vld [vmem:[#allocation8 + $0x20] sm:$0xf] }
  0x2d   :  { %559 = vmatpush.bf16.msra.mxu2 %v1104_v34  ;;  %v1325_v53 = vld [vmem:[#allocation8 + $0x134] sm:$0xf0]  ;;  %v1151_v54 = vld [vmem:[#allocation8 + $0x1b0] sm:$0xf]  ;;  %v1024_v57 = vor.u32 %v1309_v51, %v1023_v49  ;;  %v1291_v60 = vld [vmem:[#allocation8 + $0x24] sm:$0xf0] }
  0x2e   :  { %572 = vmatpush.bf16.msra.mxu3 %v1168_v38  ;;  %v1341_v55 = vld [vmem:[#allocation8 + $0x1b4] sm:$0xf0]  ;;  %v1088_v58 = vor.u32 %v1325_v53, %v1087_v52  ;;  %v1015_v61 = vld [vmem:[#allocation8 + $0xa0] sm:$0xf]  ;;  %v1307_v63 = vld [vmem:[#allocation8 + $0xa4] sm:$0xf0]  ;;  %v952_v4 = vor.u32 %v1291_v60, %v951_v59 }
  0x2f   :  { %534 = vmatpush.bf16.msra.mxu0 %v968_v44  ;;  %v1152_v62 = vor.u32 %v1341_v55, %v1151_v54  ;;  %v1079_v0 = vld [vmem:[#allocation8 + $0x120] sm:$0xf]  ;;  %v1323_v1 = vld [vmem:[#allocation8 + $0x124] sm:$0xf0]  ;;  %v1016_v5 = vor.u32 %v1307_v63, %v1015_v61  ;;  %v943_v7 = vld [vmem:[#allocation8 + $0x10] sm:$0xf] }
  0x30   :  { %547 = vmatpush.bf16.msra.mxu1 %v1032_v45  ;;  %v1143_v2 = vld [vmem:[#allocation8 + $0x1a0] sm:$0xf]  ;;  %v1339_v3 = vld [vmem:[#allocation8 + $0x1a4] sm:$0xf0]  ;;  %v1080_v6 = vor.u32 %v1323_v1, %v1079_v0  ;;  %v1289_v8 = vld [vmem:[#allocation8 + $0x14] sm:$0xf0] }
  0x31   :  { %560 = vmatpush.bf16.msra.mxu2 %v1096_v46  ;;  %v1007_v9 = vld [vmem:[#allocation8 + $0x90] sm:$0xf]  ;;  %v1144_v10 = vor.u32 %v1339_v3, %v1143_v2  ;;  %v1305_v11 = vld [vmem:[#allocation8 + $0x94] sm:$0xf0]  ;;  %v935_v16 = vld [vmem:[#allocation8] sm:$0xf]  ;;  %v944_v17 = vor.u32 %v1289_v8, %v943_v7 }
  0x32   :  { %573 = vmatpush.bf16.msra.mxu3 %v1160_v50  ;;  %v1071_v12 = vld [vmem:[#allocation8 + $0x110] sm:$0xf]  ;;  %v1321_v13 = vld [vmem:[#allocation8 + $0x114] sm:$0xf0]  ;;  %v1287_v18 = vld [vmem:[#allocation8 + $0x4] sm:$0xf0]  ;;  %v1008_v21 = vor.u32 %v1305_v11, %v1007_v9 }
  0x33   :  { %535 = vmatpush.bf16.msra.mxu0 %v960_v56  ;;  %v1135_v14 = vld [vmem:[#allocation8 + $0x190] sm:$0xf]  ;;  %v1337_v15 = vld [vmem:[#allocation8 + $0x194] sm:$0xf0]  ;;  %v999_v19 = vld [vmem:[#allocation8 + $0x80] sm:$0xf]  ;;  %v1072_v22 = vor.u32 %v1321_v13, %v1071_v12  ;;  %v936_v33 = vor.u32 %v1287_v18, %v935_v16 }
  0x34   :  { %548 = vmatpush.bf16.msra.mxu1 %v1024_v57  ;;  %v1303_v20 = vld [vmem:[#allocation8 + $0x84] sm:$0xf0]  ;;  %v1063_v23 = vld [vmem:[#allocation8 + $0x100] sm:$0xf]  ;;  %v1136_v26 = vor.u32 %v1337_v15, %v1135_v14  ;;  %v1300_v28 = vld [vmem:[#allocation8 + $0x74] sm:$0xf] }
  0x35   :  { %561 = vmatpush.bf16.msra.mxu2 %v1088_v58  ;;  %v1319_v24 = vld [vmem:[#allocation8 + $0x104] sm:$0xf0]  ;;  %v1127_v25 = vld [vmem:[#allocation8 + $0x180] sm:$0xf]  ;;  %v993_v29 = vld [vmem:[#allocation8 + $0x78] sm:$0xf0]  ;;  %v1000_v36 = vor.u32 %v1303_v20, %v999_v19 }
  0x36   :  { %574 = vmatpush.bf16.msra.mxu3 %v1152_v62  ;;  %v1335_v27 = vld [vmem:[#allocation8 + $0x184] sm:$0xf0]  ;;  %v1316_v30 = vld [vmem:[#allocation8 + $0xf4] sm:$0xf]  ;;  %v1057_v31 = vld [vmem:[#allocation8 + $0xf8] sm:$0xf0]  ;;  %v1064_v37 = vor.u32 %v1319_v24, %v1063_v23  ;;  %v996_v41 = vor.u32 %v1300_v28, %v993_v29 }
  0x37   :  { %536 = vmatpush.bf16.msra.mxu0 %v952_v4  ;;  %v129_v32 = vld [vmem:[#allocation5 + $0x8] sm:$0xff]  ;;  %v1332_v34 = vld [vmem:[#allocation8 + $0x174] sm:$0xf]  ;;  %v1128_v40 = vor.u32 %v1335_v27, %v1127_v25  ;;  %v1298_v42 = vld [vmem:[#allocation8 + $0x64] sm:$0xf]  ;;  %v1060_v44 = vor.u32 %v1316_v30, %v1057_v31  ;;  %vm638_vm0 = vcmask 1043456  }
  0x38   :  { %549 = vmatpush.bf16.msra.mxu1 %v1016_v5  ;;  %v1121_v35 = vld [vmem:[#allocation8 + $0x178] sm:$0xf0]  ;;  %134 = vst [vmem:[#allocation1 + $0x10] ss:$2 sm:$0xff] %v129_v32  ;;  %v1348_v38 = vld [vmem:[#allocation8 + $0x1f4] sm:$0xf] }
  0x39   :  { %562 = vmatpush.bf16.msra.mxu2 %v1080_v6  ;;  %v1185_v39 = vld [vmem:[#allocation8 + $0x1f8] sm:$0xf0]  ;;  %v985_v43 = vld [vmem:[#allocation8 + $0x68] sm:$0xf0]  ;;  %v1124_v45 = vor.u32 %v1332_v34, %v1121_v35  ;;  %v1314_v46 = vld [vmem:[#allocation8 + $0xe4] sm:$0xf] }
  0x3a   :  { %575 = vmatpush.bf16.msra.mxu3 %v1144_v10  ;;  %v1049_v47 = vld [vmem:[#allocation8 + $0xe8] sm:$0xf0]  ;;  %v128_v48 = vld [vmem:[#allocation5] sm:$0xff]  ;;  %v1188_v49 = vor.u32 %v1348_v38, %v1185_v39  ;;  %v1330_v50 = vld [vmem:[#allocation8 + $0x164] sm:$0xf]  ;;  %v988_v54 = vor.u32 %v1298_v42, %v985_v43  ;;  %p118_p5 = scmp.lt.s32.totalorder %s1652_s0, 2 }
  0x3b   :  { %537 = vmatpush.bf16.msra.mxu0 %v944_v17  ;;  %v1113_v51 = vld [vmem:[#allocation8 + $0x168] sm:$0xf0]  ;;  %132 = vst [vmem:[#allocation1] ss:$2 sm:$0xff] %v128_v48  ;;  %v1346_v52 = vld [vmem:[#allocation8 + $0x1e4] sm:$0xf]  ;;  %v1052_v58 = vor.u32 %v1314_v46, %v1049_v47 }
  0x3c   :  { %550 = vmatpush.bf16.msra.mxu1 %v1008_v21  ;;  %v1177_v53 = vld [vmem:[#allocation8 + $0x1e8] sm:$0xf0]  ;;  %v1296_v55 = vld [vmem:[#allocation8 + $0x54] sm:$0xf]  ;;  %v977_v56 = vld [vmem:[#allocation8 + $0x58] sm:$0xf0]  ;;  %v1116_v59 = vor.u32 %v1330_v50, %v1113_v51 }
  0x3d   :  { %563 = vmatpush.bf16.msra.mxu2 %v1072_v22  ;;  %v1312_v57 = vld [vmem:[#allocation8 + $0xd4] sm:$0xf]  ;;  %v1180_v62 = vor.u32 %v1346_v52, %v1177_v53  ;;  %v1041_v0 = vld [vmem:[#allocation8 + $0xd8] sm:$0xf0]  ;;  %v980_v6 = vor.u32 %v1296_v55, %v977_v56  ;;  %v1294_v7 = vld [vmem:[#allocation8 + $0x44] sm:$0xf] }
  0x3e   :  { %576 = vmatpush.bf16.msra.mxu3 %v1136_v26  ;;  %v1328_v1 = vld [vmem:[#allocation8 + $0x154] sm:$0xf]  ;;  %v1105_v2 = vld [vmem:[#allocation8 + $0x158] sm:$0xf0]  ;;  %v969_v8 = vld [vmem:[#allocation8 + $0x48] sm:$0xf0]  ;;  %v1044_v10 = vor.u32 %v1312_v57, %v1041_v0 }
  0x3f   :  { %538 = vmatpush.bf16.msra.mxu0 %v936_v33  ;;  %v137_v60 = vld.sshfl [vmem:[#allocation1 + $0x10] sm:$0xff pattern:$0x75316420]  ;;  %v138_v61 = vld.sshfl [vmem:[#allocation1 + $0x18] sm:$0xff pattern:$0x75316420]  ;;  %v1108_v11 = vor.u32 %v1328_v1, %v1105_v2  ;;  %v972_v22 = vor.u32 %v1294_v7, %v969_v8 }
  0x40   :  { %551 = vmatpush.bf16.msra.mxu1 %v1000_v36  ;;  %v1621_v63 = vpack.c.bf16 %v137_v60, %v137_v60  ;;  %v1344_v3 = vld [vmem:[#allocation8 + $0x1d4] sm:$0xf]  ;;  %v1169_v4 = vld [vmem:[#allocation8 + $0x1d8] sm:$0xf0]  ;;  %v1623_v5 = vpack.c.bf16 %v138_v61, %v138_v61  ;;  %v1310_v9 = vld [vmem:[#allocation8 + $0xc4] sm:$0xf] }
  0x41   :  { %564 = vmatpush.bf16.msra.mxu2 %v1064_v37  ;;  %v1172_v14 = vor.u32 %v1344_v3, %v1169_v4  ;;  %v1033_v17 = vld [vmem:[#allocation8 + $0xc8] sm:$0xf0]  ;;  %v1326_v18 = vld [vmem:[#allocation8 + $0x144] sm:$0xf]  ;;  %v1292_v25 = vld [vmem:[#allocation8 + $0x34] sm:$0xf] }
  0x42   :  { %577 = vmatpush.bf16.msra.mxu3 %v1128_v40  ;;  %v135_v12 = vld.sshfl [vmem:[#allocation1] sm:$0xff pattern:$0x75316420]  ;;  %v136_v13 = vld.sshfl [vmem:[#allocation1 + $0x8] sm:$0xff pattern:$0x75316420]  ;;  %v1036_v23 = vor.u32 %v1310_v9, %v1033_v17 }
  0x43   :  { %583 = vmatpush.bf16.msrb.mxu0 %v996_v41  ;;  %v1626_v15 = vpack.c.bf16 %v135_v12, %v135_v12  ;;  %v1628_v16 = vpack.c.bf16 %v136_v13, %v136_v13  ;;  %v1097_v19 = vld [vmem:[#allocation8 + $0x148] sm:$0xf0]  ;;  %v1342_v20 = vld [vmem:[#allocation8 + $0x1c4] sm:$0xf]  ;;  %v961_v26 = vld [vmem:[#allocation8 + $0x38] sm:$0xf0] }
  0x44   :  { %596 = vmatpush.bf16.msrb.mxu1 %v1060_v44  ;;  %565 = vmatmul.bf16.vlgmr.msra.gmra.mxu2 %v1621_v63  ;;  %v1161_v21 = vld [vmem:[#allocation8 + $0x1c8] sm:$0xf0]  ;;  %v1100_v24 = vor.u32 %v1326_v18, %v1097_v19  ;;  %v1308_v27 = vld [vmem:[#allocation8 + $0xb4] sm:$0xf]  ;;  %v1025_v29 = vld [vmem:[#allocation8 + $0xb8] sm:$0xf0]  ;;  %v964_v34 = vor.u32 %v1292_v25, %v961_v26 }
  0x45   :  { %609 = vmatpush.bf16.msrb.mxu2 %v1124_v45  ;;  %578 = vmatmul.bf16.vlgmr.msra.gmra.mxu3 %v1623_v5  ;;  %v1164_v28 = vor.u32 %v1342_v20, %v1161_v21  ;;  %v1324_v30 = vld [vmem:[#allocation8 + $0x134] sm:$0xf]  ;;  %v1089_v31 = vld [vmem:[#allocation8 + $0x138] sm:$0xf0]  ;;  %v1290_v35 = vld [vmem:[#allocation8 + $0x24] sm:$0xf]  ;;  %v1028_v36 = vor.u32 %v1308_v27, %v1025_v29 }
  0x46   :  { %622 = vmatpush.bf16.msrb.mxu3 %v1188_v49  ;;  %552 = vmatmul.bf16.vlgmr.msra.gmra.mxu1 %v1628_v16  ;;  %v1340_v32 = vld [vmem:[#allocation8 + $0x1b4] sm:$0xf]  ;;  %v1153_v33 = vld [vmem:[#allocation8 + $0x1b8] sm:$0xf0]  ;;  %v1092_v37 = vor.u32 %v1324_v30, %v1089_v31  ;;  %v953_v38 = vld [vmem:[#allocation8 + $0x28] sm:$0xf0] }
  0x47   :  { %584 = vmatpush.bf16.msrb.mxu0 %v988_v54  ;;  %v1306_v39 = vld [vmem:[#allocation8 + $0xa4] sm:$0xf]  ;;  %v1156_v40 = vor.u32 %v1340_v32, %v1153_v33  ;;  %v1017_v41 = vld [vmem:[#allocation8 + $0xa8] sm:$0xf0]  ;;  %v956_v46 = vor.u32 %v1290_v35, %v953_v38  ;;  %v1288_v49 = vld [vmem:[#allocation8 + $0x14] sm:$0xf] }
  0x48   :  { %597 = vmatpush.bf16.msrb.mxu1 %v1052_v58  ;;  %539 = vmatmul.bf16.vlgmr.msra.gmra.mxu0 %v1626_v15  ;;  %v1322_v42 = vld [vmem:[#allocation8 + $0x124] sm:$0xf]  ;;  %v1081_v43 = vld [vmem:[#allocation8 + $0x128] sm:$0xf0]  ;;  %v1020_v47 = vor.u32 %v1306_v39, %v1017_v41  ;;  %v945_v50 = vld [vmem:[#allocation8 + $0x18] sm:$0xf0] }
  0x49   :  { %610 = vmatpush.bf16.msrb.mxu2 %v1116_v59  ;;  %v1338_v44 = vld [vmem:[#allocation8 + $0x1a4] sm:$0xf]  ;;  %v1145_v45 = vld [vmem:[#allocation8 + $0x1a8] sm:$0xf0]  ;;  %v1084_v48 = vor.u32 %v1322_v42, %v1081_v43  ;;  %v1304_v51 = vld [vmem:[#allocation8 + $0x94] sm:$0xf]  ;;  %v948_v58 = vor.u32 %v1288_v49, %v945_v50 }
  0x4a   :  { %623 = vmatpush.bf16.msrb.mxu3 %v1180_v62  ;;  %v1148_v52 = vor.u32 %v1338_v44, %v1145_v45  ;;  %v1009_v53 = vld [vmem:[#allocation8 + $0x98] sm:$0xf0]  ;;  %v1320_v54 = vld [vmem:[#allocation8 + $0x114] sm:$0xf]  ;;  %v1286_v61 = vld [vmem:[#allocation8 + $0x4] sm:$0xf] }
  0x4b   :  { %585 = vmatpush.bf16.msrb.mxu0 %v980_v6  ;;  %v1073_v55 = vld [vmem:[#allocation8 + $0x118] sm:$0xf0]  ;;  %v1336_v56 = vld [vmem:[#allocation8 + $0x194] sm:$0xf]  ;;  %v1012_v59 = vor.u32 %v1304_v51, %v1009_v53  ;;  %v937_v62 = vld [vmem:[#allocation8 + $0x8] sm:$0xf0] }
  0x4c   :  { %598 = vmatpush.bf16.msrb.mxu1 %v1044_v10  ;;  %v1137_v57 = vld [vmem:[#allocation8 + $0x198] sm:$0xf0]  ;;  %v1076_v60 = vor.u32 %v1320_v54, %v1073_v55  ;;  %v1302_v0 = vld [vmem:[#allocation8 + $0x84] sm:$0xf]  ;;  %v1001_v2 = vld [vmem:[#allocation8 + $0x88] sm:$0xf0]  ;;  %v940_v8 = vor.u32 %v1286_v61, %v937_v62 }
  0x4d   :  { %611 = vmatpush.bf16.msrb.mxu2 %v1108_v11  ;;  %v1140_v1 = vor.u32 %v1336_v56, %v1137_v57  ;;  %v1318_v3 = vld [vmem:[#allocation8 + $0x104] sm:$0xf]  ;;  %v1065_v4 = vld [vmem:[#allocation8 + $0x108] sm:$0xf0]  ;;  %v1004_v9 = vor.u32 %v1302_v0, %v1001_v2  ;;  %v1357_v12 = vld [vmem:[#allocation10 + $0x38] sm:$0xff]  ;;  %s1662_s0 = smov (!%p118_p5, %s1652_s0), 2 }
  0x4e   :  { %624 = vmatpush.bf16.msrb.mxu3 %v1172_v14  ;;  %v1334_v6 = vld [vmem:[#allocation8 + $0x184] sm:$0xf]  ;;  %v1129_v7 = vld [vmem:[#allocation8 + $0x188] sm:$0xf0]  ;;  %v1068_v10 = vor.u32 %v1318_v3, %v1065_v4  ;;  %v1365_v13 = vld [vmem:[#allocation10 + $0x78] sm:$0xff]  ;;  %s120_s5 = scalar_lea.vmem %s1659_s7, %s1662_s0  ;;  %s1551_s0 = smov [#allocation14]  }
  0x4f   :  { %586 = vmatpush.bf16.msrb.mxu0 %v972_v22  ;;  %v1132_v11 = vor.u32 %v1334_v6, %v1129_v7  ;;  %v1356_v14 = vld [vmem:[#allocation10 + $0x30] sm:$0xff]  ;;  %v1355_v19 = vld [vmem:[#allocation10 + $0x28] sm:$0xff]  ;;  %v1350_v32 = vld [vmem:[#allocation10] sm:$0xff]  ;;  %s912_s7 = sshll.u32 %s1551_s0, 4  ;;  %s914_s26 = sshll.u32 %s1660_s8, 4  ;;  %s913_s7 = int_to_ptr.vmem [resolvable:$true] %s912_s7  ;;  %s915_s26 = int_to_ptr.hbm [resolvable:$true] %s914_s26 }
  0x50   :  { %599 = vmatpush.bf16.msrb.mxu1 %v1036_v23  ;;  %v1364_v17 = vld [vmem:[#allocation10 + $0x70] sm:$0xff]  ;;  %v1363_v20 = vld [vmem:[#allocation10 + $0x68] sm:$0xff]  ;;  %v1353_v23 = vld [vmem:[#allocation10 + $0x18] sm:$0xff] }
  0x51   :  { %612 = vmatpush.bf16.msrb.mxu2 %v1100_v24  ;;  %v1361_v24 = vld [vmem:[#allocation10 + $0x58] sm:$0xff]  ;;  %v1360_v29 = vld [vmem:[#allocation10 + $0x50] sm:$0xff]  ;;  %v1351_v30 = vld [vmem:[#allocation10 + $0x8] sm:$0xff] }
  0x52   :  { %625 = vmatpush.bf16.msrb.mxu3 %v1164_v28  ;;  %v1352_v28 = vld [vmem:[#allocation10 + $0x10] sm:$0xff]  ;;  %v1359_v31 = vld [vmem:[#allocation10 + $0x48] sm:$0xff]  ;;  %v1358_v33 = vld [vmem:[#allocation10 + $0x40] sm:$0xff] }
  0x53   :  { %587 = vmatpush.bf16.msrb.mxu0 %v964_v34  ;;  %v1372_v41 = vld [vmem:[#allocation13 + $0x30] sm:$0xff]  ;;  %v1371_v49 = vld [vmem:[#allocation13 + $0x28] sm:$0xff]  ;;  %v1370_v55 = vld [vmem:[#allocation13 + $0x20] sm:$0xff] }
  0x54   :  { %600 = vmatpush.bf16.msrb.mxu1 %v1028_v36  ;;  %v647_v36 = vld [vmem:[%s1655_s3] sm:$0x3]  ;;  %v1368_v3 = vld [vmem:[#allocation13 + $0x10] sm:$0xff]  ;;  %v1367_v4 = vld [vmem:[#allocation13 + $0x8] sm:$0xff] }
  0x55   :  { %613 = vmatpush.bf16.msrb.mxu2 %v1092_v37  ;;  %v1373_v37 = vld [vmem:[#allocation13 + $0x38] sm:$0xff]  ;;  %v1366_v6 = vld [vmem:[#allocation13] sm:$0xff] }
  0x56   :  { %626 = vmatpush.bf16.msrb.mxu3 %v1156_v40  ;;  %v650_v40 = vperm.slane %v647_v36, 1  ;;  %v1384_v7 = vld [vmem:[#allocation11] ss:$0 sm:$0xff] }
  0x57   :  { %588 = vmatpush.bf16.msrb.mxu0 %v956_v46  ;;  %v649_v46 = vperm.slane %v647_v36, 0 }
  0x58   :  { %601 = vmatpush.bf16.msrb.mxu1 %v1020_v47  ;;  %v651_v47 = vrot.slane %v650_v40, 4 }
  0x59   :  { %614 = vmatpush.bf16.msrb.mxu2 %v1084_v48 }
  0x5a   :  { %627 = vmatpush.bf16.msrb.mxu3 %v1148_v52  ;;  %v652_v54 = vsel %vm638_vm0, %v649_v46, %v651_v47 }
  0x5b   :  { %589 = vmatpush.bf16.msrb.mxu0 %v948_v58 }
  0x5c   :  { %602 = vmatpush.bf16.msrb.mxu1 %v1012_v59 }
  0x5d   :  { %615 = vmatpush.bf16.msrb.mxu2 %v1076_v60  ;;  %v1369_v60 = vld [vmem:[#allocation13 + $0x18] sm:$0xff] }
  0x5e   :  { %628 = vmatpush.bf16.msrb.mxu3 %v1140_v1 }
  0x5f   :  { %590 = vmatpush.bf16.msrb.mxu0 %v940_v8 }
  0x60   :  { %603 = vmatpush.bf16.msrb.mxu1 %v1004_v9 }
  0x61   :  { %616 = vmatpush.bf16.msrb.mxu2 %v1068_v10 }
  0x62   :  { %629 = vmatpush.bf16.msrb.mxu3 %v1132_v11  ;;  %591 = vmatmul.bf16.vlgmr.msrb.gmra.mxu0 %v1626_v15 }
  0x63   :  { %604 = vmatmul.bf16.vlgmr.msrb.gmra.mxu1 %v1628_v16  ;;  %796 = vmatpush.bf16.msra.mxu0 %v1357_v12  ;;  %v1354_v16 = vld [vmem:[#allocation10 + $0x20] sm:$0xff] }
  0x64   :  { %617 = vmatmul.bf16.vlgmr.msrb.gmra.mxu2 %v1621_v63  ;;  %809 = vmatpush.bf16.msra.mxu1 %v1365_v13  ;;  %v1362_v63 = vld [vmem:[#allocation10 + $0x60] sm:$0xff] }
  0x65   :  { %630 = vmatmul.bf16.vlgmr.msrb.gmra.mxu3 %v1623_v5  ;;  %892 = vmatpush.bf16.msra.mxu2 %v1373_v37 }
  0x67   :  { %797 = vmatpush.bf16.msra.mxu0 %v1356_v14 }
  0x68   :  { %810 = vmatpush.bf16.msra.mxu1 %v1364_v17 }
  0x69   :  { %893 = vmatpush.bf16.msra.mxu2 %v1372_v41 }
  0x6b   :  { %798 = vmatpush.bf16.msra.mxu0 %v1355_v19 }
  0x6c   :  { %811 = vmatpush.bf16.msra.mxu1 %v1363_v20 }
  0x6d   :  { %894 = vmatpush.bf16.msra.mxu2 %v1371_v49 }
  0x6f   :  { %799 = vmatpush.bf16.msra.mxu0 %v1354_v16 }
  0x70   :  { %812 = vmatpush.bf16.msra.mxu1 %v1362_v63 }
  0x71   :  { %895 = vmatpush.bf16.msra.mxu2 %v1370_v55 }
  0x73   :  { %800 = vmatpush.bf16.msra.mxu0 %v1353_v23 }
  0x74   :  { %813 = vmatpush.bf16.msra.mxu1 %v1361_v24 }
  0x75   :  { %896 = vmatpush.bf16.msra.mxu2 %v1369_v60 }
  0x77   :  { %801 = vmatpush.bf16.msra.mxu0 %v1352_v28 }
  0x78   :  { %814 = vmatpush.bf16.msra.mxu1 %v1360_v29 }
  0x79   :  { %897 = vmatpush.bf16.msra.mxu2 %v1368_v3 }
  0x7b   :  { %802 = vmatpush.bf16.msra.mxu0 %v1351_v30 }
  0x7c   :  { %815 = vmatpush.bf16.msra.mxu1 %v1359_v31 }
  0x7d   :  { %898 = vmatpush.bf16.msra.mxu2 %v1367_v4 }
  0x7f   :  { %803 = vmatpush.bf16.msra.mxu0 %v1350_v32 }
  0x80   :  { %816 = vmatpush.bf16.msra.mxu1 %v1358_v33 }
  0x81   :  { %899 = vmatpush.bf16.msra.mxu2 %v1366_v6 }
  0xc3   :  { %v553_v18 = vpop.f32.mrf.mxu1 }
  0xc5   :  { %v540_v21 = vpop.f32.mrf.mxu0 }
  0xc6   :  { %v554_v38 = vadd.f32 %v553_v18, %v540_v21  ;;  %v1385_v18 = vld [vmem:[%s120_s5] ss:$0 sm:$0xff] }
  0xc7   :  { %v566_v22 = vpop.f32.mrf.mxu2 }
  0xc8   :  { %v579_v15 = vpop.f32.mrf.mxu3  ;;  %v567_v43 = vadd.f32 %v566_v22, %v554_v38 }
  0xca   :  { %v580_v52 = vadd.f32 %v579_v15, %v567_v43 }
  0xcb   :  { %v555_v5 = vpop.f32.mrf.mxu1 }
  0xcd   :  { %v542_v25 = vpop.f32.mrf.mxu0 }
  0xcf   :  { %v568_v26 = vpop.f32.mrf.mxu2 }
  0xd0   :  { %v581_v27 = vpop.f32.mrf.mxu3 }
  0xdf   :  { %v592_v34 = vpop.f32.mrf.mxu0 }
  0xe0   :  { %v605_v35 = vpop.f32.mrf.mxu1 }
  0xe1   :  { %v606_v39 = vadd.f32 %v605_v35, %v592_v34 }
  0xe7   :  { %v618_v42 = vpop.f32.mrf.mxu2  ;;  %v594_v48 = vpop.f32.mrf.mxu0 }
  0xe8   :  { %v619_v44 = vadd.f32 %v618_v42, %v606_v39  ;;  %v631_v45 = vpop.f32.mrf.mxu3  ;;  %v607_v50 = vpop.f32.mrf.mxu1 }
  0xea   :  { %v632_v51 = vadd.f32 %v631_v45, %v619_v44 }
  0xec   :  { %v637_v53 = vrot.slane %v632_v51, 4 }
  0xee   :  { %v639_v56 = vsel %vm638_vm0, %v580_v52, %v637_v53 }
  0xef   :  { %v654_v57 = vadd.f32 %v652_v54, %v639_v56  ;;  %v620_v58 = vpop.f32.mrf.mxu2 }
  0xf0   :  { %v633_v59 = vpop.f32.mrf.mxu3 }
  0xf1   :  { %1386 = vtanh.f32 %v654_v57 }
  0xf7   :  { %v1387_v61 = vpop.eup %1386 }
  0xf8   :  { %657 = vst [vmem:[#allocation1] ss:$2 sm:$0xff] %v1387_v61 }
  0xff   :  { %v658_v62 = vld.sshfl [vmem:[#allocation1] sm:$0xff pattern:$0x75316420]  ;;  %v659_v0 = vld.sshfl [vmem:[#allocation1 + $0x8] sm:$0xff pattern:$0x75316420] }
 0x100   :  { %v662_v1 = vpack.c.bf16 %v658_v62, %v658_v62  ;;  %v663_v2 = vpack.c.bf16 %v659_v0, %v659_v0 }
 0x102   :  { %804 = vmatmul.bf16.vlgmr.msra.gmra.mxu0 %v662_v1  ;;  %817 = vmatmul.bf16.vlgmr.msra.gmra.mxu1 %v663_v2 }
 0x17f   :  { %v805_v8 = vpop.f32.mrf.mxu0  ;;  %v818_v9 = vpop.f32.mrf.mxu1 }
 0x180   :  { %v806_v10 = vadd.f32 %v1384_v7, %v805_v8 }
 0x182   :  { %v819_v11 = vadd.f32 %v818_v9, %v806_v10 }
 0x184   :  { %1388 = vtanh.f32 %v819_v11 }
 0x187   :  { %v807_v12 = vpop.f32.mrf.mxu0  ;;  %v820_v13 = vpop.f32.mrf.mxu1 }
 0x18a   :  { %v1389_v14 = vpop.eup %1388 }
 0x18b   :  { %v823_v17 = vpack.c.bf16 %v1389_v14, %v1389_v14 }
 0x18d   :  { %900 = vmatmul.bf16.vlgmr.msra.gmra.mxu2 %v823_v17 }
 0x210   :  { %v901_v19 = vpop.f32.mrf.mxu2 }
 0x211   :  { %v902_v20 = vadd.f32 %v1385_v18, %v901_v19 }
 0x213   :  { %v905_v21 = vpack.c.bf16 %v902_v20, %v902_v20 }
 0x215   :  { %906 = vst [vmem:[#allocation14] sm:$0x3] %v905_v21 }
 0x216   :  { %917 = dma.vmem_to_hbm [thread:$0]  %s913_s7, 32, %s915_s26, [#allocation7]  }
 0x218   :  { %v903_v22 = vpop.f32.mrf.mxu2 }
 0x219   :  { %1540 = dma.done.wait [#allocation7], 32  }
 0x21a   :  { %1541 = vsyncadd [#allocation7], 4294967264 }
 0x21b   :  { %922 = vsyncpa [#allocation6], 1 }
 0x21c   :  { %923 = vsyncpa [#allocation9], 1 }
 0x21d   :  { %924 = vsyncpa [#allocation12], 1 }
 0x21e   :  { %925 = vsyncpa [#allocation7], 1 }

// kernel: tpu_custom_call.1
= control target key start
LH: loop header
LB: loop body
LE: loop exit
PB: predicated region body
PF: predicated region fallthrough
CT: control target
= control target key end

     0   :  { %14 = vsyncpa [#allocation6], 0  ;;  %s1652_s0 = inlined_call_operand.<no memory space> [shape: s32[1], index: 0, kind: input, shape index: {}]   ;;  %s1653_s1 = inlined_call_operand.hbm [shape: f32[4,512], index: 1, kind: input, shape index: {}]   ;;  %s1654_s2 = inlined_call_operand.hbm [shape: bf16[512,256], index: 2, kind: input, shape index: {}]   ;;  %s1655_s3 = inlined_call_operand.vmem [shape: f32[1,256], index: 3, kind: input, shape index: {}]   ;;  %s1656_s4 = inlined_call_operand.hbm [shape: bf16[256,128], index: 4, kind: input, shape index: {}]   ;;  %s1657_s5 = inlined_call_operand.hbm [shape: f32[1,128], index: 5, kind: input, shape index: {}]   ;;  %s1658_s6 = inlined_call_operand.hbm [shape: bf16[3,128,128], index: 6, kind: input, shape index: {}]   ;;  %s1659_s7 = inlined_call_operand.vmem [shape: f32[3,1,128], index: 7, kind: input, shape index: {}]   ;;  %s1660_s8 = inlined_call_operand.hbm [shape: bf16[4,128], index: 8, kind: output, shape index: {}]  }
   0x1   :  { %15 = vsyncpa [#allocation9], 0 }
   0x2   :  { %16 = vsyncpa [#allocation12], 0  ;;  %s33_s29 = sshll.u32 %s1654_s2, 4  ;;  %s34_s29 = int_to_ptr.hbm [resolvable:$true] %s33_s29 }
   0x3   :  { %17 = vsyncpa [#allocation7], 0  ;;  %s1542_s30 = smov [#allocation8]   ;;  %s62_s12 = sshll.u32 %s1657_s5, 4  ;;  %s63_s12 = int_to_ptr.hbm [resolvable:$true] %s62_s12 }
   0x4   :  { %s35_s9 = sshll.u32 %s1542_s30, 4  ;;  %s1543_s13 = smov 128   ;;  %s36_s9 = int_to_ptr.vmem [resolvable:$true] %s35_s9 }
   0x5   :  { %s1544_s14 = smov 8   ;;  %s1545_s15 = smov [#allocation11]  }
   0x6   :  { %41 = dma.hbm_to_vmem [thread:$0]  %s34_s29, 8192, %s36_s9, [#allocation9], %s1543_s13, %s1543_s13, %s1544_s14  }
   0x7   :  { %s64_s16 = sshll.u32 %s1545_s15, 4  ;;  %s23_s19 = sshll.u32 %s1653_s1, 4  ;;  %s65_s16 = int_to_ptr.vmem [resolvable:$true] %s64_s16  ;;  %s24_s19 = int_to_ptr.hbm [resolvable:$true] %s23_s19 }
   0x8   :  { %67 = dma.hbm_to_vmem [thread:$0]  %s63_s12, 16, %s65_s16, [#allocation12]  }
   0x9   :  { %s48_s21 = sshll.u32 %s1656_s4, 4  ;;  %s1546_s22 = smov [#allocation5]   ;;  %s49_s21 = int_to_ptr.hbm [resolvable:$true] %s48_s21 }
   0xa   :  { %s25_s23 = sshll.u32 %s1546_s22, 4  ;;  %s1547_s5 = smov [#allocation10]   ;;  %s26_s23 = int_to_ptr.vmem [resolvable:$true] %s25_s23 }
   0xb   :  { %28 = dma.hbm_to_vmem [thread:$0]  %s24_s19, 256, %s26_s23, [#allocation6]  }
   0xc   :  { %s50_s24 = sshll.u32 %s1547_s5, 4  ;;  %s1548_s25 = smov 64   ;;  %s51_s24 = int_to_ptr.vmem [resolvable:$true] %s50_s24 }
   0xd   :  { %s1549_s26 = smov 4   ;;  %s1285_s28 = sshll.u32 %s1652_s0, 6 }
   0xe   :  { %56 = dma.hbm_to_vmem [thread:$0]  %s49_s21, 2048, %s51_s24, [#allocation9], %s1548_s25, %s1548_s25, %s1549_s26  }
   0xf   :  { %s75_s9 = scalar_lea.hbm %s1658_s6, %s1285_s28  ;;  %s1550_s4 = smov [#allocation13]  }
  0x10   :  { %s78_s10 = sshll.u32 %s1550_s4, 4  ;;  %s76_s11 = sshll.u32 %s75_s9, 4  ;;  %s79_s10 = int_to_ptr.vmem [resolvable:$true] %s78_s10  ;;  %s77_s11 = int_to_ptr.hbm [resolvable:$true] %s76_s11 }
  0x11   :  { %s1486_s12 = sshra.s32 %s77_s11, 4  ;;  %s1490_s16 = scalar_lea.hbm %s1658_s6, 192  ;;  %s1487_s12 = int_to_ptr.hbm [resolvable:$true] %s1486_s12 }
  0x12   :  { %s1488_s13 = scalar_lea.hbm %s1487_s12, 64  ;;  %p1491_p1 = scmp.lt.s32.totalorder %s1487_s12, %s1658_s6 }
  0x13   :  { %p1489_p0 = scmp.ne.s32.totalorder %s1487_s12, %s1488_s13  ;;  %p1492_p2 = scmp.lt.s32.totalorder %s1490_s16, %s1488_s13 }
  0x15   :  { %p1493_p3 = por %p1492_p2, %p1491_p1 }
  0x17   :  { %p1494_p4 = pnand %p1493_p3, %p1489_p0 }
  0x19   :  { %1497 = shalt.err (!%p1494_p4)
}
  0x1a   :  { %84 = dma.hbm_to_vmem [thread:$0]  %s77_s11, 1024, %s79_s10, [#allocation12], %s1548_s25, %s1548_s25, %s1549_s26  }
  0x1b   :  { %1534 = dma.done.wait [#allocation6], 256  }
  0x1c   :  { %1535 = vsyncadd [#allocation6], 4294967040 }
  0x1d   :  { %1536 = dma.done.wait [#allocation9], 10240  }
  0x1e   :  { %1537 = vsyncadd [#allocation9], 4294957056 }
  0x1f   :  { %1538 = dma.done.wait [#allocation12], 1040  }
  0x20   :  { %1539 = vsyncadd [#allocation12], 4294966256  ;;  %v991_v0 = vld [vmem:[#allocation8 + $0x70] sm:$0xf]  ;;  %v1301_v1 = vld [vmem:[#allocation8 + $0x74] sm:$0xf0] }
  0x21   :  { %v1055_v2 = vld [vmem:[#allocation8 + $0xf0] sm:$0xf]  ;;  %v992_v3 = vor.u32 %v1301_v1, %v991_v0  ;;  %v1317_v4 = vld [vmem:[#allocation8 + $0xf4] sm:$0xf0]  ;;  %v983_v11 = vld [vmem:[#allocation8 + $0x60] sm:$0xf] }
  0x22   :  { %v1119_v5 = vld [vmem:[#allocation8 + $0x170] sm:$0xf]  ;;  %v1333_v6 = vld [vmem:[#allocation8 + $0x174] sm:$0xf0]  ;;  %v1056_v7 = vor.u32 %v1317_v4, %v1055_v2  ;;  %v1299_v13 = vld [vmem:[#allocation8 + $0x64] sm:$0xf0] }
  0x23   :  { %v1120_v8 = vor.u32 %v1333_v6, %v1119_v5  ;;  %v1183_v9 = vld [vmem:[#allocation8 + $0x1f0] sm:$0xf]  ;;  %v1349_v10 = vld [vmem:[#allocation8 + $0x1f4] sm:$0xf0]  ;;  %531 = vmatpush.bf16.msra.mxu0 %v992_v3  ;;  %v1047_v14 = vld [vmem:[#allocation8 + $0xe0] sm:$0xf]  ;;  %v984_v16 = vor.u32 %v1299_v13, %v983_v11 }
  0x24   :  { %v1184_v12 = vor.u32 %v1349_v10, %v1183_v9  ;;  %v1315_v15 = vld [vmem:[#allocation8 + $0xe4] sm:$0xf0]  ;;  %544 = vmatpush.bf16.msra.mxu1 %v1056_v7  ;;  %v1111_v18 = vld [vmem:[#allocation8 + $0x160] sm:$0xf]  ;;  %v975_v23 = vld [vmem:[#allocation8 + $0x50] sm:$0xf] }
  0x25   :  { %557 = vmatpush.bf16.msra.mxu2 %v1120_v8  ;;  %v1048_v17 = vor.u32 %v1315_v15, %v1047_v14  ;;  %v1331_v19 = vld [vmem:[#allocation8 + $0x164] sm:$0xf0]  ;;  %v1175_v20 = vld [vmem:[#allocation8 + $0x1e0] sm:$0xf]  ;;  %v1297_v24 = vld [vmem:[#allocation8 + $0x54] sm:$0xf0] }
  0x26   :  { %570 = vmatpush.bf16.msra.mxu3 %v1184_v12  ;;  %v1112_v21 = vor.u32 %v1331_v19, %v1111_v18  ;;  %v1347_v22 = vld [vmem:[#allocation8 + $0x1e4] sm:$0xf0]  ;;  %v1039_v26 = vld [vmem:[#allocation8 + $0xd0] sm:$0xf]  ;;  %v1313_v27 = vld [vmem:[#allocation8 + $0xd4] sm:$0xf0]  ;;  %v976_v29 = vor.u32 %v1297_v24, %v975_v23 }
  0x27   :  { %v1176_v25 = vor.u32 %v1347_v22, %v1175_v20  ;;  %v1103_v28 = vld [vmem:[#allocation8 + $0x150] sm:$0xf]  ;;  %532 = vmatpush.bf16.msra.mxu0 %v984_v16  ;;  %v1329_v30 = vld [vmem:[#allocation8 + $0x154] sm:$0xf0]  ;;  %v1040_v33 = vor.u32 %v1313_v27, %v1039_v26  ;;  %v967_v35 = vld [vmem:[#allocation8 + $0x40] sm:$0xf] }
  0x28   :  { %v1167_v31 = vld [vmem:[#allocation8 + $0x1d0] sm:$0xf]  ;;  %v1345_v32 = vld [vmem:[#allocation8 + $0x1d4] sm:$0xf0]  ;;  %545 = vmatpush.bf16.msra.mxu1 %v1048_v17  ;;  %v1104_v34 = vor.u32 %v1329_v30, %v1103_v28  ;;  %v1295_v36 = vld [vmem:[#allocation8 + $0x44] sm:$0xf0] }
  0x29   :  { %558 = vmatpush.bf16.msra.mxu2 %v1112_v21  ;;  %v1031_v37 = vld [vmem:[#allocation8 + $0xc0] sm:$0xf]  ;;  %v1168_v38 = vor.u32 %v1345_v32, %v1167_v31  ;;  %v1311_v39 = vld [vmem:[#allocation8 + $0xc4] sm:$0xf0]  ;;  %v968_v44 = vor.u32 %v1295_v36, %v967_v35  ;;  %v959_v47 = vld [vmem:[#allocation8 + $0x30] sm:$0xf] }
  0x2a   :  { %571 = vmatpush.bf16.msra.mxu3 %v1176_v25  ;;  %v1095_v40 = vld [vmem:[#allocation8 + $0x140] sm:$0xf]  ;;  %v1327_v41 = vld [vmem:[#allocation8 + $0x144] sm:$0xf0]  ;;  %v1032_v45 = vor.u32 %v1311_v39, %v1031_v37  ;;  %v1293_v48 = vld [vmem:[#allocation8 + $0x34] sm:$0xf0] }
  0x2b   :  { %v1159_v42 = vld [vmem:[#allocation8 + $0x1c0] sm:$0xf]  ;;  %v1343_v43 = vld [vmem:[#allocation8 + $0x1c4] sm:$0xf0]  ;;  %533 = vmatpush.bf16.msra.mxu0 %v976_v29  ;;  %v1096_v46 = vor.u32 %v1327_v41, %v1095_v40  ;;  %v1023_v49 = vld [vmem:[#allocation8 + $0xb0] sm:$0xf]  ;;  %v960_v56 = vor.u32 %v1293_v48, %v959_v47 }
  0x2c   :  { %546 = vmatpush.bf16.msra.mxu1 %v1040_v33  ;;  %v1160_v50 = vor.u32 %v1343_v43, %v1159_v42  ;;  %v1309_v51 = vld [vmem:[#allocation8 + $0xb4] sm:$0xf0]  ;;  %v1087_v52 = vld [vmem:[#allocation8 + $0x130] sm:$0xf]  ;;  %v951_v59 = vld [vmem:[#allocation8 + $0x20] sm:$0xf] }
  0x2d   :  { %559 = vmatpush.bf16.msra.mxu2 %v1104_v34  ;;  %v1325_v53 = vld [vmem:[#allocation8 + $0x134] sm:$0xf0]  ;;  %v1151_v54 = vld [vmem:[#allocation8 + $0x1b0] sm:$0xf]  ;;  %v1024_v57 = vor.u32 %v1309_v51, %v1023_v49  ;;  %v1291_v60 = vld [vmem:[#allocation8 + $0x24] sm:$0xf0] }
  0x2e   :  { %572 = vmatpush.bf16.msra.mxu3 %v1168_v38  ;;  %v1341_v55 = vld [vmem:[#allocation8 + $0x1b4] sm:$0xf0]  ;;  %v1088_v58 = vor.u32 %v1325_v53, %v1087_v52  ;;  %v1015_v61 = vld [vmem:[#allocation8 + $0xa0] sm:$0xf]  ;;  %v1307_v63 = vld [vmem:[#allocation8 + $0xa4] sm:$0xf0]  ;;  %v952_v4 = vor.u32 %v1291_v60, %v951_v59 }
  0x2f   :  { %534 = vmatpush.bf16.msra.mxu0 %v968_v44  ;;  %v1152_v62 = vor.u32 %v1341_v55, %v1151_v54  ;;  %v1079_v0 = vld [vmem:[#allocation8 + $0x120] sm:$0xf]  ;;  %v1323_v1 = vld [vmem:[#allocation8 + $0x124] sm:$0xf0]  ;;  %v1016_v5 = vor.u32 %v1307_v63, %v1015_v61  ;;  %v943_v7 = vld [vmem:[#allocation8 + $0x10] sm:$0xf] }
  0x30   :  { %547 = vmatpush.bf16.msra.mxu1 %v1032_v45  ;;  %v1143_v2 = vld [vmem:[#allocation8 + $0x1a0] sm:$0xf]  ;;  %v1339_v3 = vld [vmem:[#allocation8 + $0x1a4] sm:$0xf0]  ;;  %v1080_v6 = vor.u32 %v1323_v1, %v1079_v0  ;;  %v1289_v8 = vld [vmem:[#allocation8 + $0x14] sm:$0xf0] }
  0x31   :  { %560 = vmatpush.bf16.msra.mxu2 %v1096_v46  ;;  %v1007_v9 = vld [vmem:[#allocation8 + $0x90] sm:$0xf]  ;;  %v1144_v10 = vor.u32 %v1339_v3, %v1143_v2  ;;  %v1305_v11 = vld [vmem:[#allocation8 + $0x94] sm:$0xf0]  ;;  %v935_v16 = vld [vmem:[#allocation8] sm:$0xf]  ;;  %v944_v17 = vor.u32 %v1289_v8, %v943_v7 }
  0x32   :  { %573 = vmatpush.bf16.msra.mxu3 %v1160_v50  ;;  %v1071_v12 = vld [vmem:[#allocation8 + $0x110] sm:$0xf]  ;;  %v1321_v13 = vld [vmem:[#allocation8 + $0x114] sm:$0xf0]  ;;  %v1287_v18 = vld [vmem:[#allocation8 + $0x4] sm:$0xf0]  ;;  %v1008_v21 = vor.u32 %v1305_v11, %v1007_v9 }
  0x33   :  { %535 = vmatpush.bf16.msra.mxu0 %v960_v56  ;;  %v1135_v14 = vld [vmem:[#allocation8 + $0x190] sm:$0xf]  ;;  %v1337_v15 = vld [vmem:[#allocation8 + $0x194] sm:$0xf0]  ;;  %v999_v19 = vld [vmem:[#allocation8 + $0x80] sm:$0xf]  ;;  %v1072_v22 = vor.u32 %v1321_v13, %v1071_v12  ;;  %v936_v33 = vor.u32 %v1287_v18, %v935_v16 }
  0x34   :  { %548 = vmatpush.bf16.msra.mxu1 %v1024_v57  ;;  %v1303_v20 = vld [vmem:[#allocation8 + $0x84] sm:$0xf0]  ;;  %v1063_v23 = vld [vmem:[#allocation8 + $0x100] sm:$0xf]  ;;  %v1136_v26 = vor.u32 %v1337_v15, %v1135_v14  ;;  %v1300_v28 = vld [vmem:[#allocation8 + $0x74] sm:$0xf] }
  0x35   :  { %561 = vmatpush.bf16.msra.mxu2 %v1088_v58  ;;  %v1319_v24 = vld [vmem:[#allocation8 + $0x104] sm:$0xf0]  ;;  %v1127_v25 = vld [vmem:[#allocation8 + $0x180] sm:$0xf]  ;;  %v993_v29 = vld [vmem:[#allocation8 + $0x78] sm:$0xf0]  ;;  %v1000_v36 = vor.u32 %v1303_v20, %v999_v19 }
  0x36   :  { %574 = vmatpush.bf16.msra.mxu3 %v1152_v62  ;;  %v1335_v27 = vld [vmem:[#allocation8 + $0x184] sm:$0xf0]  ;;  %v1316_v30 = vld [vmem:[#allocation8 + $0xf4] sm:$0xf]  ;;  %v1057_v31 = vld [vmem:[#allocation8 + $0xf8] sm:$0xf0]  ;;  %v1064_v37 = vor.u32 %v1319_v24, %v1063_v23  ;;  %v996_v41 = vor.u32 %v1300_v28, %v993_v29 }
  0x37   :  { %536 = vmatpush.bf16.msra.mxu0 %v952_v4  ;;  %v129_v32 = vld [vmem:[#allocation5 + $0x8] sm:$0xff]  ;;  %v1332_v34 = vld [vmem:[#allocation8 + $0x174] sm:$0xf]  ;;  %v1128_v40 = vor.u32 %v1335_v27, %v1127_v25  ;;  %v1298_v42 = vld [vmem:[#allocation8 + $0x64] sm:$0xf]  ;;  %v1060_v44 = vor.u32 %v1316_v30, %v1057_v31  ;;  %vm638_vm0 = vcmask 1043456  }
  0x38   :  { %549 = vmatpush.bf16.msra.mxu1 %v1016_v5  ;;  %v1121_v35 = vld [vmem:[#allocation8 + $0x178] sm:$0xf0]  ;;  %134 = vst [vmem:[#allocation1 + $0x10] ss:$2 sm:$0xff] %v129_v32  ;;  %v1348_v38 = vld [vmem:[#allocation8 + $0x1f4] sm:$0xf] }
  0x39   :  { %562 = vmatpush.bf16.msra.mxu2 %v1080_v6  ;;  %v1185_v39 = vld [vmem:[#allocation8 + $0x1f8] sm:$0xf0]  ;;  %v985_v43 = vld [vmem:[#allocation8 + $0x68] sm:$0xf0]  ;;  %v1124_v45 = vor.u32 %v1332_v34, %v1121_v35  ;;  %v1314_v46 = vld [vmem:[#allocation8 + $0xe4] sm:$0xf] }
  0x3a   :  { %575 = vmatpush.bf16.msra.mxu3 %v1144_v10  ;;  %v1049_v47 = vld [vmem:[#allocation8 + $0xe8] sm:$0xf0]  ;;  %v128_v48 = vld [vmem:[#allocation5] sm:$0xff]  ;;  %v1188_v49 = vor.u32 %v1348_v38, %v1185_v39  ;;  %v1330_v50 = vld [vmem:[#allocation8 + $0x164] sm:$0xf]  ;;  %v988_v54 = vor.u32 %v1298_v42, %v985_v43  ;;  %p118_p5 = scmp.lt.s32.totalorder %s1652_s0, 2 }
  0x3b   :  { %537 = vmatpush.bf16.msra.mxu0 %v944_v17  ;;  %v1113_v51 = vld [vmem:[#allocation8 + $0x168] sm:$0xf0]  ;;  %132 = vst [vmem:[#allocation1] ss:$2 sm:$0xff] %v128_v48  ;;  %v1346_v52 = vld [vmem:[#allocation8 + $0x1e4] sm:$0xf]  ;;  %v1052_v58 = vor.u32 %v1314_v46, %v1049_v47 }
  0x3c   :  { %550 = vmatpush.bf16.msra.mxu1 %v1008_v21  ;;  %v1177_v53 = vld [vmem:[#allocation8 + $0x1e8] sm:$0xf0]  ;;  %v1296_v55 = vld [vmem:[#allocation8 + $0x54] sm:$0xf]  ;;  %v977_v56 = vld [vmem:[#allocation8 + $0x58] sm:$0xf0]  ;;  %v1116_v59 = vor.u32 %v1330_v50, %v1113_v51 }
  0x3d   :  { %563 = vmatpush.bf16.msra.mxu2 %v1072_v22  ;;  %v1312_v57 = vld [vmem:[#allocation8 + $0xd4] sm:$0xf]  ;;  %v1180_v62 = vor.u32 %v1346_v52, %v1177_v53  ;;  %v1041_v0 = vld [vmem:[#allocation8 + $0xd8] sm:$0xf0]  ;;  %v980_v6 = vor.u32 %v1296_v55, %v977_v56  ;;  %v1294_v7 = vld [vmem:[#allocation8 + $0x44] sm:$0xf] }
  0x3e   :  { %576 = vmatpush.bf16.msra.mxu3 %v1136_v26  ;;  %v1328_v1 = vld [vmem:[#allocation8 + $0x154] sm:$0xf]  ;;  %v1105_v2 = vld [vmem:[#allocation8 + $0x158] sm:$0xf0]  ;;  %v969_v8 = vld [vmem:[#allocation8 + $0x48] sm:$0xf0]  ;;  %v1044_v10 = vor.u32 %v1312_v57, %v1041_v0 }
  0x3f   :  { %538 = vmatpush.bf16.msra.mxu0 %v936_v33  ;;  %v137_v60 = vld.sshfl [vmem:[#allocation1 + $0x10] sm:$0xff pattern:$0x75316420]  ;;  %v138_v61 = vld.sshfl [vmem:[#allocation1 + $0x18] sm:$0xff pattern:$0x75316420]  ;;  %v1108_v11 = vor.u32 %v1328_v1, %v1105_v2  ;;  %v972_v22 = vor.u32 %v1294_v7, %v969_v8 }
  0x40   :  { %551 = vmatpush.bf16.msra.mxu1 %v1000_v36  ;;  %v1621_v63 = vpack.c.bf16 %v137_v60, %v137_v60  ;;  %v1344_v3 = vld [vmem:[#allocation8 + $0x1d4] sm:$0xf]  ;;  %v1169_v4 = vld [vmem:[#allocation8 + $0x1d8] sm:$0xf0]  ;;  %v1623_v5 = vpack.c.bf16 %v138_v61, %v138_v61  ;;  %v1310_v9 = vld [vmem:[#allocation8 + $0xc4] sm:$0xf] }
  0x41   :  { %564 = vmatpush.bf16.msra.mxu2 %v1064_v37  ;;  %v1172_v14 = vor.u32 %v1344_v3, %v1169_v4  ;;  %v1033_v17 = vld [vmem:[#allocation8 + $0xc8] sm:$0xf0]  ;;  %v1326_v18 = vld [vmem:[#allocation8 + $0x144] sm:$0xf]  ;;  %v1292_v25 = vld [vmem:[#allocation8 + $0x34] sm:$0xf] }
  0x42   :  { %577 = vmatpush.bf16.msra.mxu3 %v1128_v40  ;;  %v135_v12 = vld.sshfl [vmem:[#allocation1] sm:$0xff pattern:$0x75316420]  ;;  %v136_v13 = vld.sshfl [vmem:[#allocation1 + $0x8] sm:$0xff pattern:$0x75316420]  ;;  %v1036_v23 = vor.u32 %v1310_v9, %v1033_v17 }
  0x43   :  { %583 = vmatpush.bf16.msrb.mxu0 %v996_v41  ;;  %v1626_v15 = vpack.c.bf16 %v135_v12, %v135_v12  ;;  %v1628_v16 = vpack.c.bf16 %v136_v13, %v136_v13  ;;  %v1097_v19 = vld [vmem:[#allocation8 + $0x148] sm:$0xf0]  ;;  %v1342_v20 = vld [vmem:[#allocation8 + $0x1c4] sm:$0xf]  ;;  %v961_v26 = vld [vmem:[#allocation8 + $0x38] sm:$0xf0] }
  0x44   :  { %596 = vmatpush.bf16.msrb.mxu1 %v1060_v44  ;;  %565 = vmatmul.bf16.vlgmr.msra.gmra.mxu2 %v1621_v63  ;;  %v1161_v21 = vld [vmem:[#allocation8 + $0x1c8] sm:$0xf0]  ;;  %v1100_v24 = vor.u32 %v1326_v18, %v1097_v19  ;;  %v1308_v27 = vld [vmem:[#allocation8 + $0xb4] sm:$0xf]  ;;  %v1025_v29 = vld [vmem:[#allocation8 + $0xb8] sm:$0xf0]  ;;  %v964_v34 = vor.u32 %v1292_v25, %v961_v26 }
  0x45   :  { %609 = vmatpush.bf16.msrb.mxu2 %v1124_v45  ;;  %578 = vmatmul.bf16.vlgmr.msra.gmra.mxu3 %v1623_v5  ;;  %v1164_v28 = vor.u32 %v1342_v20, %v1161_v21  ;;  %v1324_v30 = vld [vmem:[#allocation8 + $0x134] sm:$0xf]  ;;  %v1089_v31 = vld [vmem:[#allocation8 + $0x138] sm:$0xf0]  ;;  %v1290_v35 = vld [vmem:[#allocation8 + $0x24] sm:$0xf]  ;;  %v1028_v36 = vor.u32 %v1308_v27, %v1025_v29 }
  0x46   :  { %622 = vmatpush.bf16.msrb.mxu3 %v1188_v49  ;;  %552 = vmatmul.bf16.vlgmr.msra.gmra.mxu1 %v1628_v16  ;;  %v1340_v32 = vld [vmem:[#allocation8 + $0x1b4] sm:$0xf]  ;;  %v1153_v33 = vld [vmem:[#allocation8 + $0x1b8] sm:$0xf0]  ;;  %v1092_v37 = vor.u32 %v1324_v30, %v1089_v31  ;;  %v953_v38 = vld [vmem:[#allocation8 + $0x28] sm:$0xf0] }
  0x47   :  { %584 = vmatpush.bf16.msrb.mxu0 %v988_v54  ;;  %v1306_v39 = vld [vmem:[#allocation8 + $0xa4] sm:$0xf]  ;;  %v1156_v40 = vor.u32 %v1340_v32, %v1153_v33  ;;  %v1017_v41 = vld [vmem:[#allocation8 + $0xa8] sm:$0xf0]  ;;  %v956_v46 = vor.u32 %v1290_v35, %v953_v38  ;;  %v1288_v49 = vld [vmem:[#allocation8 + $0x14] sm:$0xf] }
  0x48   :  { %597 = vmatpush.bf16.msrb.mxu1 %v1052_v58  ;;  %539 = vmatmul.bf16.vlgmr.msra.gmra.mxu0 %v1626_v15  ;;  %v1322_v42 = vld [vmem:[#allocation8 + $0x124] sm:$0xf]  ;;  %v1081_v43 = vld [vmem:[#allocation8 + $0x128] sm:$0xf0]  ;;  %v1020_v47 = vor.u32 %v1306_v39, %v1017_v41  ;;  %v945_v50 = vld [vmem:[#allocation8 + $0x18] sm:$0xf0] }
  0x49   :  { %610 = vmatpush.bf16.msrb.mxu2 %v1116_v59  ;;  %v1338_v44 = vld [vmem:[#allocation8 + $0x1a4] sm:$0xf]  ;;  %v1145_v45 = vld [vmem:[#allocation8 + $0x1a8] sm:$0xf0]  ;;  %v1084_v48 = vor.u32 %v1322_v42, %v1081_v43  ;;  %v1304_v51 = vld [vmem:[#allocation8 + $0x94] sm:$0xf]  ;;  %v948_v58 = vor.u32 %v1288_v49, %v945_v50 }
  0x4a   :  { %623 = vmatpush.bf16.msrb.mxu3 %v1180_v62  ;;  %v1148_v52 = vor.u32 %v1338_v44, %v1145_v45  ;;  %v1009_v53 = vld [vmem:[#allocation8 + $0x98] sm:$0xf0]  ;;  %v1320_v54 = vld [vmem:[#allocation8 + $0x114] sm:$0xf]  ;;  %v1286_v61 = vld [vmem:[#allocation8 + $0x4] sm:$0xf] }
  0x4b   :  { %585 = vmatpush.bf16.msrb.mxu0 %v980_v6  ;;  %v1073_v55 = vld [vmem:[#allocation8 + $0x118] sm:$0xf0]  ;;  %v1336_v56 = vld [vmem:[#allocation8 + $0x194] sm:$0xf]  ;;  %v1012_v59 = vor.u32 %v1304_v51, %v1009_v53  ;;  %v937_v62 = vld [vmem:[#allocation8 + $0x8] sm:$0xf0] }
  0x4c   :  { %598 = vmatpush.bf16.msrb.mxu1 %v1044_v10  ;;  %v1137_v57 = vld [vmem:[#allocation8 + $0x198] sm:$0xf0]  ;;  %v1076_v60 = vor.u32 %v1320_v54, %v1073_v55  ;;  %v1302_v0 = vld [vmem:[#allocation8 + $0x84] sm:$0xf]  ;;  %v1001_v2 = vld [vmem:[#allocation8 + $0x88] sm:$0xf0]  ;;  %v940_v8 = vor.u32 %v1286_v61, %v937_v62 }
  0x4d   :  { %611 = vmatpush.bf16.msrb.mxu2 %v1108_v11  ;;  %v1140_v1 = vor.u32 %v1336_v56, %v1137_v57  ;;  %v1318_v3 = vld [vmem:[#allocation8 + $0x104] sm:$0xf]  ;;  %v1065_v4 = vld [vmem:[#allocation8 + $0x108] sm:$0xf0]  ;;  %v1004_v9 = vor.u32 %v1302_v0, %v1001_v2  ;;  %v1357_v12 = vld [vmem:[#allocation10 + $0x38] sm:$0xff]  ;;  %s1662_s0 = smov (!%p118_p5, %s1652_s0), 2 }
  0x4e   :  { %624 = vmatpush.bf16.msrb.mxu3 %v1172_v14  ;;  %v1334_v6 = vld [vmem:[#allocation8 + $0x184] sm:$0xf]  ;;  %v1129_v7 = vld [vmem:[#allocation8 + $0x188] sm:$0xf0]  ;;  %v1068_v10 = vor.u32 %v1318_v3, %v1065_v4  ;;  %v1365_v13 = vld [vmem:[#allocation10 + $0x78] sm:$0xff]  ;;  %s120_s5 = scalar_lea.vmem %s1659_s7, %s1662_s0  ;;  %s1551_s0 = smov [#allocation14]  }
  0x4f   :  { %586 = vmatpush.bf16.msrb.mxu0 %v972_v22  ;;  %v1132_v11 = vor.u32 %v1334_v6, %v1129_v7  ;;  %v1356_v14 = vld [vmem:[#allocation10 + $0x30] sm:$0xff]  ;;  %v1355_v19 = vld [vmem:[#allocation10 + $0x28] sm:$0xff]  ;;  %v1350_v32 = vld [vmem:[#allocation10] sm:$0xff]  ;;  %s912_s7 = sshll.u32 %s1551_s0, 4  ;;  %s914_s26 = sshll.u32 %s1660_s8, 4  ;;  %s913_s7 = int_to_ptr.vmem [resolvable:$true] %s912_s7  ;;  %s915_s26 = int_to_ptr.hbm [resolvable:$true] %s914_s26 }
  0x50   :  { %599 = vmatpush.bf16.msrb.mxu1 %v1036_v23  ;;  %v1364_v17 = vld [vmem:[#allocation10 + $0x70] sm:$0xff]  ;;  %v1363_v20 = vld [vmem:[#allocation10 + $0x68] sm:$0xff]  ;;  %v1353_v23 = vld [vmem:[#allocation10 + $0x18] sm:$0xff] }
  0x51   :  { %612 = vmatpush.bf16.msrb.mxu2 %v1100_v24  ;;  %v1361_v24 = vld [vmem:[#allocation10 + $0x58] sm:$0xff]  ;;  %v1360_v29 = vld [vmem:[#allocation10 + $0x50] sm:$0xff]  ;;  %v1351_v30 = vld [vmem:[#allocation10 + $0x8] sm:$0xff] }
  0x52   :  { %625 = vmatpush.bf16.msrb.mxu3 %v1164_v28  ;;  %v1352_v28 = vld [vmem:[#allocation10 + $0x10] sm:$0xff]  ;;  %v1359_v31 = vld [vmem:[#allocation10 + $0x48] sm:$0xff]  ;;  %v1358_v33 = vld [vmem:[#allocation10 + $0x40] sm:$0xff] }
  0x53   :  { %587 = vmatpush.bf16.msrb.mxu0 %v964_v34  ;;  %v1372_v41 = vld [vmem:[#allocation13 + $0x30] sm:$0xff]  ;;  %v1371_v49 = vld [vmem:[#allocation13 + $0x28] sm:$0xff]  ;;  %v1370_v55 = vld [vmem:[#allocation13 + $0x20] sm:$0xff] }
  0x54   :  { %600 = vmatpush.bf16.msrb.mxu1 %v1028_v36  ;;  %v647_v36 = vld [vmem:[%s1655_s3] sm:$0x3]  ;;  %v1368_v3 = vld [vmem:[#allocation13 + $0x10] sm:$0xff]  ;;  %v1367_v4 = vld [vmem:[#allocation13 + $0x8] sm:$0xff] }
  0x55   :  { %613 = vmatpush.bf16.msrb.mxu2 %v1092_v37  ;;  %v1373_v37 = vld [vmem:[#allocation13 + $0x38] sm:$0xff]  ;;  %v1366_v6 = vld [vmem:[#allocation13] sm:$0xff] }
  0x56   :  { %626 = vmatpush.bf16.msrb.mxu3 %v1156_v40  ;;  %v650_v40 = vperm.slane %v647_v36, 1  ;;  %v1384_v7 = vld [vmem:[#allocation11] ss:$0 sm:$0xff] }
  0x57   :  { %588 = vmatpush.bf16.msrb.mxu0 %v956_v46  ;;  %v649_v46 = vperm.slane %v647_v36, 0 }
  0x58   :  { %601 = vmatpush.bf16.msrb.mxu1 %v1020_v47  ;;  %v651_v47 = vrot.slane %v650_v40, 4 }
  0x59   :  { %614 = vmatpush.bf16.msrb.mxu2 %v1084_v48 }
  0x5a   :  { %627 = vmatpush.bf16.msrb.mxu3 %v1148_v52  ;;  %v652_v54 = vsel %vm638_vm0, %v649_v46, %v651_v47 }
  0x5b   :  { %589 = vmatpush.bf16.msrb.mxu0 %v948_v58 }
  0x5c   :  { %602 = vmatpush.bf16.msrb.mxu1 %v1012_v59 }
  0x5d   :  { %615 = vmatpush.bf16.msrb.mxu2 %v1076_v60  ;;  %v1369_v60 = vld [vmem:[#allocation13 + $0x18] sm:$0xff] }
  0x5e   :  { %628 = vmatpush.bf16.msrb.mxu3 %v1140_v1 }
  0x5f   :  { %590 = vmatpush.bf16.msrb.mxu0 %v940_v8 }
  0x60   :  { %603 = vmatpush.bf16.msrb.mxu1 %v1004_v9 }
  0x61   :  { %616 = vmatpush.bf16.msrb.mxu2 %v1068_v10 }
  0x62   :  { %629 = vmatpush.bf16.msrb.mxu3 %v1132_v11  ;;  %591 = vmatmul.bf16.vlgmr.msrb.gmra.mxu0 %v1626_v15 }
  0x63   :  { %604 = vmatmul.bf16.vlgmr.msrb.gmra.mxu1 %v1628_v16  ;;  %796 = vmatpush.bf16.msra.mxu0 %v1357_v12  ;;  %v1354_v16 = vld [vmem:[#allocation10 + $0x20] sm:$0xff] }
  0x64   :  { %617 = vmatmul.bf16.vlgmr.msrb.gmra.mxu2 %v1621_v63  ;;  %809 = vmatpush.bf16.msra.mxu1 %v1365_v13  ;;  %v1362_v63 = vld [vmem:[#allocation10 + $0x60] sm:$0xff] }
  0x65   :  { %630 = vmatmul.bf16.vlgmr.msrb.gmra.mxu3 %v1623_v5  ;;  %892 = vmatpush.bf16.msra.mxu2 %v1373_v37 }
  0x67   :  { %797 = vmatpush.bf16.msra.mxu0 %v1356_v14 }
  0x68   :  { %810 = vmatpush.bf16.msra.mxu1 %v1364_v17 }
  0x69   :  { %893 = vmatpush.bf16.msra.mxu2 %v1372_v41 }
  0x6b   :  { %798 = vmatpush.bf16.msra.mxu0 %v1355_v19 }
  0x6c   :  { %811 = vmatpush.bf16.msra.mxu1 %v1363_v20 }
  0x6d   :  { %894 = vmatpush.bf16.msra.mxu2 %v1371_v49 }
  0x6f   :  { %799 = vmatpush.bf16.msra.mxu0 %v1354_v16 }
  0x70   :  { %812 = vmatpush.bf16.msra.mxu1 %v1362_v63 }
  0x71   :  { %895 = vmatpush.bf16.msra.mxu2 %v1370_v55 }
  0x73   :  { %800 = vmatpush.bf16.msra.mxu0 %v1353_v23 }
  0x74   :  { %813 = vmatpush.bf16.msra.mxu1 %v1361_v24 }
  0x75   :  { %896 = vmatpush.bf16.msra.mxu2 %v1369_v60 }
  0x77   :  { %801 = vmatpush.bf16.msra.mxu0 %v1352_v28 }
  0x78   :  { %814 = vmatpush.bf16.msra.mxu1 %v1360_v29 }
  0x79   :  { %897 = vmatpush.bf16.msra.mxu2 %v1368_v3 }
  0x7b   :  { %802 = vmatpush.bf16.msra.mxu0 %v1351_v30 }
  0x7c   :  { %815 = vmatpush.bf16.msra.mxu1 %v1359_v31 }
  0x7d   :  { %898 = vmatpush.bf16.msra.mxu2 %v1367_v4 }
  0x7f   :  { %803 = vmatpush.bf16.msra.mxu0 %v1350_v32 }
  0x80   :  { %816 = vmatpush.bf16.msra.mxu1 %v1358_v33 }
  0x81   :  { %899 = vmatpush.bf16.msra.mxu2 %v1366_v6 }
  0xc3   :  { %v553_v18 = vpop.f32.mrf.mxu1 }
  0xc5   :  { %v540_v21 = vpop.f32.mrf.mxu0 }
  0xc6   :  { %v554_v38 = vadd.f32 %v553_v18, %v540_v21  ;;  %v1385_v18 = vld [vmem:[%s120_s5] ss:$0 sm:$0xff] }
  0xc7   :  { %v566_v22 = vpop.f32.mrf.mxu2 }
  0xc8   :  { %v579_v15 = vpop.f32.mrf.mxu3  ;;  %v567_v43 = vadd.f32 %v566_v22, %v554_v38 }
  0xca   :  { %v580_v52 = vadd.f32 %v579_v15, %v567_v43 }
  0xcb   :  { %v555_v5 = vpop.f32.mrf.mxu1 }
  0xcd   :  { %v542_v25 = vpop.f32.mrf.mxu0 }
  0xcf   :  { %v568_v26 = vpop.f32.mrf.mxu2 }
  0xd0   :  { %v581_v27 = vpop.f32.mrf.mxu3 }
  0xdf   :  { %v592_v34 = vpop.f32.mrf.mxu0 }
  0xe0   :  { %v605_v35 = vpop.f32.mrf.mxu1 }
  0xe1   :  { %v606_v39 = vadd.f32 %v605_v35, %v592_v34 }
  0xe7   :  { %v618_v42 = vpop.f32.mrf.mxu2  ;;  %v594_v48 = vpop.f32.mrf.mxu0 }
  0xe8   :  { %v619_v44 = vadd.f32 %v618_v42, %v606_v39  ;;  %v631_v45 = vpop.f32.mrf.mxu3  ;;  %v607_v50 = vpop.f32.mrf.mxu1 }
  0xea   :  { %v632_v51 = vadd.f32 %v631_v45, %v619_v44 }
  0xec   :  { %v637_v53 = vrot.slane %v632_v51, 4 }
  0xee   :  { %v639_v56 = vsel %vm638_vm0, %v580_v52, %v637_v53 }
  0xef   :  { %v654_v57 = vadd.f32 %v652_v54, %v639_v56  ;;  %v620_v58 = vpop.f32.mrf.mxu2 }
  0xf0   :  { %v633_v59 = vpop.f32.mrf.mxu3 }
  0xf1   :  { %1386 = vtanh.f32 %v654_v57 }
  0xf7   :  { %v1387_v61 = vpop.eup %1386 }
  0xf8   :  { %657 = vst [vmem:[#allocation1] ss:$2 sm:$0xff] %v1387_v61 }
  0xff   :  { %v658_v62 = vld.sshfl [vmem:[#allocation1] sm:$0xff pattern:$0x75316420]  ;;  %v659_v0 = vld.sshfl [vmem:[#allocation1 + $0x8] sm:$0xff pattern:$0x75316420] }
 0x100   :  { %v662_v1 = vpack.c.bf16 %v658_v62, %v658_v62  ;;  %v663_v2 = vpack.c.bf16 %v659_v0, %v659_v0 }
 0x102   :  { %804 = vmatmul.bf16.vlgmr.msra.gmra.mxu0 %v662_v1  ;;  %817 = vmatmul.bf16.vlgmr.msra.gmra.mxu1 %v663_v2 }
 0x17f   :  { %v805_v8 = vpop.f32.mrf.mxu0  ;;  %v818_v9 = vpop.f32.mrf.mxu1 }
 0x180   :  { %v806_v10 = vadd.f32 %v1384_v7, %v805_v8 }
 0x182   :  { %v819_v11 = vadd.f32 %v818_v9, %v806_v10 }
 0x184   :  { %1388 = vtanh.f32 %v819_v11 }
 0x187   :  { %v807_v12 = vpop.f32.mrf.mxu0  ;;  %v820_v13 = vpop.f32.mrf.mxu1 }
 0x18a   :  { %v1389_v14 = vpop.eup %1388 }
 0x18b   :  { %v823_v17 = vpack.c.bf16 %v1389_v14, %v1389_v14 }
 0x18d   :  { %900 = vmatmul.bf16.vlgmr.msra.gmra.mxu2 %v823_v17 }
 0x210   :  { %v901_v19 = vpop.f32.mrf.mxu2 }
 0x211   :  { %v902_v20 = vadd.f32 %v1385_v18, %v901_v19 }
 0x213   :  { %v905_v21 = vpack.c.bf16 %v902_v20, %v902_v20 }
 0x215   :  { %906 = vst [vmem:[#allocation14] sm:$0x3] %v905_v21 }
 0x216   :  { %917 = dma.vmem_to_hbm [thread:$0]  %s913_s7, 32, %s915_s26, [#allocation7]  }
 0x218   :  { %v903_v22 = vpop.f32.mrf.mxu2 }
 0x219   :  { %1540 = dma.done.wait [#allocation7], 32  }
 0x21a   :  { %1541 = vsyncadd [#allocation7], 4294967264 }
 0x21b   :  { %922 = vsyncpa [#allocation6], 1 }
 0x21c   :  { %923 = vsyncpa [#allocation9], 1 }
 0x21d   :  { %924 = vsyncpa [#allocation12], 1 }
 0x21e   :  { %925 = vsyncpa [#allocation7], 1 }

</bundles_post_ra>
